<compile_context>
chip_gen: v7x
topology: tpu7x:2x2x1
jax: 0.10.0
libtpu: 0.0.40
codegen_flags: <defaults>
</compile_context>

<pallas_src>
import functools
import math

import jax
import jax.numpy as jnp
from jax.experimental import pallas as pl
from jax.experimental.pallas import tpu as pltpu


def _mhsa_kernel(x_ref, w_ref, b_ref, o_ref, qkv_ref, *, n_heads: int, tq: int):
    # x_ref:   (1, S, D)  bf16, current batch row (resident across q-tile axis)
    # w_ref:   (D, 3D)    bf16, [wq | wk | wv], VMEM-resident across all steps
    # b_ref:   (1, 3D)    f32,  [bq | bk | bv]
    # o_ref:   (1, tq, D) output tile (merged heads) for this (batch, q-tile)
    # qkv_ref: (S, 3D)    f32 scratch; projection computed once per batch row
    S = qkv_ref.shape[0]
    D = o_ref.shape[-1]
    W = D // n_heads
    scale = 1.0 / math.sqrt(float(W))

    qt = pl.program_id(1)

    # Fused q/k/v projection for the full sequence, once per batch row.
    # Single MXU matmul with N = 3*D (wide N), bf16 inputs, f32 accumulate.
    @pl.when(qt == 0)
    def _():
        qkv_ref[...] = (
            jnp.dot(x_ref[0], w_ref[...], preferred_element_type=jnp.float32)
            + b_ref[0]
        )

    row0 = pl.multiple_of(qt * tq, tq)

    for h in range(n_heads):  # statically unrolled; 128-aligned lane slices
        lo = h * W
        # fold 1/sqrt(W) into q (cheaper than scaling the (tq, S) scores)
        qh = (qkv_ref[pl.ds(row0, tq), lo:lo + W] * scale).astype(jnp.bfloat16)
        kh = qkv_ref[:, D + lo:D + lo + W].astype(jnp.bfloat16)          # (S, W)
        vh = qkv_ref[:, 2 * D + lo:2 * D + lo + W].astype(jnp.bfloat16)  # (S, W)

        # q @ k^T as a transposed contraction (no materialized k.T).  bf16 in,
        # f32 accumulate -> (tq, S) scores.
        s = jax.lax.dot_general(qh, kh, (((1,), (1,)), ((), ())),
                                preferred_element_type=jnp.float32)

        # numerically-stable softmax along the key axis (exact, full-S keys)
        s = s - jnp.max(s, axis=-1, keepdims=True)
        p = jnp.exp(s)
        p = p * pl.reciprocal(jnp.sum(p, axis=-1, keepdims=True), approx=True)

        ho = jnp.dot(p.astype(jnp.bfloat16), vh,
                     preferred_element_type=jnp.float32)                 # (tq, W)

        # Direct, 128-lane-aligned store of this head's slice (== the module's
        # transpose(1,2) + merge_last with zero extra data movement).
        o_ref[0, :, lo:lo + W] = ho.astype(o_ref.dtype)


def multi_headed_self_attention(x, wq, wk, wv, bq, bk, bv, n_heads):
    """x: (B, S, D); w*: (D, D) stored as (in, out) i.e. torch weight.T; b*: (D,)."""
    B, S, D = x.shape
    assert D % n_heads == 0

    # q-tile size: bounds the (tq, S) score intermediate at large S.
    tq = S if S <= 256 else 256
    assert S % tq == 0
    n_qt = S // tq

    # bf16 MXU inputs, f32 bias / accumulation.
    w_all = jnp.concatenate([wq, wk, wv], axis=1).astype(jnp.bfloat16)          # (D, 3D)
    b_all = jnp.concatenate([bq, bk, bv]).reshape(1, 3 * D).astype(jnp.float32)  # (1, 3D)
    x_bf = x.astype(jnp.bfloat16)

    kernel = functools.partial(_mhsa_kernel, n_heads=n_heads, tq=tq)

    # Explicit VMEM budget from the real buffer footprint (double-buffered x/out
    # blocks + weights/bias + qkv scratch + per-head intermediates), with margin.
    footprint = (
        2 * S * D * 2                      # x block (bf16), double-buffered
        + 2 * tq * D * x.dtype.itemsize    # out block, double-buffered
        + 2 * D * 3 * D * 2                # weight block (bf16)
        + 2 * 3 * D * 4                    # bias block (f32)
        + S * 3 * D * 4                    # qkv scratch (f32)
        + 4 * tq * S * 4 + 2 * tq * D * 4  # per-head score/prob/out intermediates
    )
    vmem_limit = int(min(max(2 * footprint, 32 * 1024 * 1024), 96 * 1024 * 1024))

    return pl.pallas_call(
        kernel,
        out_shape=jax.ShapeDtypeStruct((B, S, D), x.dtype),
        grid_spec=pltpu.PrefetchScalarGridSpec(
            num_scalar_prefetch=0,
            grid=(B, n_qt),
            in_specs=[
                # x: changes only with b -> re-DMA'd once per batch row
                pl.BlockSpec((1, S, D), lambda b, qt: (b, 0, 0)),
                # constant block index -> weights stay VMEM-resident
                pl.BlockSpec((D, 3 * D), lambda b, qt: (0, 0)),
                pl.BlockSpec((1, 3 * D), lambda b, qt: (0, 0)),
            ],
            out_specs=pl.BlockSpec((1, tq, D), lambda b, qt: (b, qt, 0)),
            # qkv projection persists across the q-tile axis (computed at qt==0)
            scratch_shapes=[pltpu.VMEM((S, 3 * D), jnp.float32)],
        ),
        compiler_params=pltpu.CompilerParams(
            # B parallel (megacore); q-tile axis carries the qkv scratch -> arbitrary
            dimension_semantics=("parallel", "arbitrary"),
            vmem_limit_bytes=vmem_limit,
        ),
    )(x_bf, w_all, b_all)


def _reference(x, wq, wk, wv, bq, bk, bv, n_heads):
    """Pure-JAX reference mirroring the PyTorch forward, with the same
    bf16-MXU-input / f32-accumulate numerics as the kernel."""
    B, S, D = x.shape
    W = D // n_heads
    bf16 = jnp.bfloat16
    xb = x.astype(bf16)

    def proj(w, b):
        y = jnp.dot(xb.reshape(B * S, D), w.astype(bf16),
                    preferred_element_type=jnp.float32) + b
        y = y.reshape(B, S, n_heads, W)
        return jnp.transpose(y, (0, 2, 1, 3))          # (B, H, S, W)

    q, k, v = proj(wq, bq), proj(wk, bk), proj(wv, bv)
    q = q * (1.0 / math.sqrt(float(W)))                # scale folded into q, like kernel
    scores = jnp.einsum("bhqd,bhkd->bhqk", q.astype(bf16), k.astype(bf16),
                        preferred_element_type=jnp.float32)
    probs = jax.nn.softmax(scores, axis=-1)
    h = jnp.einsum("bhqk,bhkd->bhqd", probs.astype(bf16), v.astype(bf16),
                   preferred_element_type=jnp.float32)
    h = jnp.transpose(h, (0, 2, 1, 3)).reshape(B, S, D)
    return h.astype(x.dtype)


if __name__ == "__main__":
    # Small shapes: batch=2, seq=8, hidden=512, heads=4 (head width 128 keeps
    # every per-head lane slice 128-aligned).
    B, S, D, H = 2, 8, 512, 4

    key = jax.random.PRNGKey(0)
    kx, kwq, kwk, kwv, kbq, kbk, kbv = jax.random.split(key, 7)

    x = jax.random.normal(kx, (B, S, D), dtype=jnp.float32)
    scale = 1.0 / math.sqrt(D)
    wq = jax.random.uniform(kwq, (D, D), jnp.float32, -scale, scale)
    wk = jax.random.uniform(kwk, (D, D), jnp.float32, -scale, scale)
    wv = jax.random.uniform(kwv, (D, D), jnp.float32, -scale, scale)
    bq = jax.random.uniform(kbq, (D,), jnp.float32, -scale, scale)
    bk = jax.random.uniform(kbk, (D,), jnp.float32, -scale, scale)
    bv = jax.random.uniform(kbv, (D,), jnp.float32, -scale, scale)

    out = multi_headed_self_attention(x, wq, wk, wv, bq, bk, bv, H)
    out = jax.block_until_ready(out)

    ref = _reference(x, wq, wk, wv, bq, bk, bv, H)
    assert out.shape == (B, S, D)
    # Tolerance sized for bf16 MXU inputs (f32 accumulation) + the approx (EUP)
    # softmax reciprocal; kernel and reference use matching numerics.
    assert jnp.allclose(out, ref, atol=2e-2, rtol=2e-2), "mismatch vs reference"

    print("KERNEL_OK")
</pallas_src>

<mosaic_0001>
module attributes {stable_mosaic.version = 11 : i64} {
  func.func @_mhsa_kernel(%arg0: i32, %arg1: i32, %arg2: memref<1x8x512xbf16, #tpu.memory_space<vmem>>, %arg3: memref<512x1536xbf16, #tpu.memory_space<vmem>>, %arg4: memref<1x1536xf32, #tpu.memory_space<vmem>>, %arg5: memref<1x8x512xf32, #tpu.memory_space<vmem>>, %arg6: memref<8x1536xf32, #tpu.memory_space<vmem>>) attributes {dimension_semantics = [#tpu.dimension_semantics<parallel>, #tpu.dimension_semantics<arbitrary>], iteration_bounds = array<i64: 2, 1>, scalar_prefetch = 0 : i64, scratch_operands = 1 : i64, tpu.core_type = #tpu.core_type<tc>, window_params = [{transform_indices = @transform_0, window_bounds = array<i64: 1, 8, 512>}, {pipeline_mode = #tpu.pipeline_mode<synchronous>, transform_indices = @transform_1, window_bounds = array<i64: 512, 1536>}, {pipeline_mode = #tpu.pipeline_mode<synchronous>, transform_indices = @transform_2, window_bounds = array<i64: 1, 1536>}, {transform_indices = @transform_3, window_bounds = array<i64: 1, 8, 512>}]} {
    %c0_i32 = arith.constant 0 : i32
    %0 = arith.cmpi eq, %arg1, %c0_i32 : i32
    %1 = arith.extui %0 : i1 to i32
    %c0_i32_0 = arith.constant 0 : i32
    %2 = arith.cmpi ne, %1, %c0_i32_0 : i32
    scf.if %2 {
      %c0_40 = arith.constant 0 : index
      %c0_41 = arith.constant 0 : index
      %c0_42 = arith.constant 0 : index
      %105 = vector.load %arg2[%c0_40, %c0_41, %c0_42] : memref<1x8x512xbf16, #tpu.memory_space<vmem>>, vector<1x8x512xbf16>
      %106 = vector.shape_cast %105 : vector<1x8x512xbf16> to vector<8x512xbf16>
      %c0_43 = arith.constant 0 : index
      %c0_44 = arith.constant 0 : index
      %107 = vector.load %arg3[%c0_43, %c0_44] : memref<512x1536xbf16, #tpu.memory_space<vmem>>, vector<512x1536xbf16>
      %cst_45 = arith.constant dense<0.000000e+00> : vector<8x1536xf32>
      %108 = tpu.matmul %106, %107, %cst_45 {dimension_numbers = #tpu.dot_dimension_numbers<[1], [0], [0], [1], [0, 0, 1, 1], [], []>} : vector<8x512xbf16>, vector<512x1536xbf16>, vector<8x1536xf32> -> vector<8x1536xf32>
      %c0_46 = arith.constant 0 : index
      %c0_47 = arith.constant 0 : index
      %109 = vector.load %arg4[%c0_46, %c0_47] : memref<1x1536xf32, #tpu.memory_space<vmem>>, vector<1x1536xf32>
      %110 = vector.shape_cast %109 : vector<1x1536xf32> to vector<1536xf32>
      %111 = vector.shape_cast %110 : vector<1536xf32> to vector<1x1536xf32>
      %112 = vector.broadcast %111 : vector<1x1536xf32> to vector<8x1536xf32>
      %113 = arith.addf %108, %112 : vector<8x1536xf32>
      %c0_48 = arith.constant 0 : index
      %c0_49 = arith.constant 0 : index
      %114 = vector.load %arg6[%c0_48, %c0_49] : memref<8x1536xf32, #tpu.memory_space<vmem>>, vector<8x1536xf32>
      tpu.vector_store %arg6[%c0_48, %c0_49], %113 {strides = array<i32>} : memref<8x1536xf32, #tpu.memory_space<vmem>>, vector<8x1536xf32>,
    } else {
    }
    %c8_i32 = arith.constant 8 : i32
    %3 = arith.muli %arg1, %c8_i32 : i32
    %4 = tpu.assume_multiple %3, 8 : i32
    %5 = arith.index_cast %4 : i32 to index
    %c0 = arith.constant 0 : index
    %6 = vector.load %arg6[%5, %c0] : memref<8x1536xf32, #tpu.memory_space<vmem>>, vector<8x128xf32>
    %cst = arith.constant 0.0883883461 : f32
    %7 = vector.broadcast %cst : f32 to vector<8x128xf32>
    %8 = arith.mulf %6, %7 : vector<8x128xf32>
    %9 = arith.truncf %8 : vector<8x128xf32> to vector<8x128xbf16>
    %c0_1 = arith.constant 0 : index
    %c512 = arith.constant 512 : index
    %10 = vector.load %arg6[%c0_1, %c512] : memref<8x1536xf32, #tpu.memory_space<vmem>>, vector<8x128xf32>
    %11 = arith.truncf %10 : vector<8x128xf32> to vector<8x128xbf16>
    %c0_2 = arith.constant 0 : index
    %c1024 = arith.constant 1024 : index
    %12 = vector.load %arg6[%c0_2, %c1024] : memref<8x1536xf32, #tpu.memory_space<vmem>>, vector<8x128xf32>
    %13 = arith.truncf %12 : vector<8x128xf32> to vector<8x128xbf16>
    %cst_3 = arith.constant dense<0.000000e+00> : vector<8x8xf32>
    %14 = tpu.matmul %9, %11, %cst_3 {dimension_numbers = #tpu.dot_dimension_numbers<[1], [1], [0], [0], [0, 0, 1, 0], [], []>} : vector<8x128xbf16>, vector<8x128xbf16>, vector<8x8xf32> -> vector<8x8xf32>
    %cst_4 = arith.constant dense<0xFF800000> : vector<8xf32>
    %15 = vector.multi_reduction <maximumf>, %14, %cst_4 [1] : vector<8x8xf32> to vector<8xf32>
    %16 = vector.shape_cast %15 : vector<8xf32> to vector<8x1xf32>
    %17 = vector.broadcast %16 : vector<8x1xf32> to vector<8x8xf32>
    %18 = arith.subf %14, %17 : vector<8x8xf32>
    %19 = math.exp %18 : vector<8x8xf32>
    %cst_5 = arith.constant dense<0.000000e+00> : vector<8xf32>
    %20 = vector.multi_reduction <add>, %19, %cst_5 [1] : vector<8x8xf32> to vector<8xf32>
    %21 = vector.shape_cast %20 : vector<8xf32> to vector<8x1xf32>
    %22 = tpu.reciprocal %21 {approx = true} : vector<8x1xf32> -> vector<8x1xf32>
    %23 = vector.broadcast %22 : vector<8x1xf32> to vector<8x8xf32>
    %24 = arith.mulf %19, %23 : vector<8x8xf32>
    %25 = arith.truncf %24 : vector<8x8xf32> to vector<8x8xbf16>
    %cst_6 = arith.constant dense<0.000000e+00> : vector<8x128xf32>
    %26 = tpu.matmul %25, %13, %cst_6 {dimension_numbers = #tpu.dot_dimension_numbers<[1], [0], [0], [1], [0, 0, 1, 1], [], []>} : vector<8x8xbf16>, vector<8x128xbf16>, vector<8x128xf32> -> vector<8x128xf32>
    %c0_7 = arith.constant 0 : index
    %c0_8 = arith.constant 0 : index
    %c0_9 = arith.constant 0 : index
    %27 = vector.load %arg5[%c0_7, %c0_8, %c0_9] : memref<1x8x512xf32, #tpu.memory_space<vmem>>, vector<1x8x128xf32>
    %28 = vector.shape_cast %27 : vector<1x8x128xf32> to vector<8x128xf32>
    %29 = vector.shape_cast %26 : vector<8x128xf32> to vector<1x8x128xf32>
    tpu.vector_store %arg5[%c0_7, %c0_8, %c0_9], %29 {strides = array<i32>} : memref<1x8x512xf32, #tpu.memory_space<vmem>>, vector<1x8x128xf32>,
    %30 = arith.index_cast %4 : i32 to index
    %c128 = arith.constant 128 : index
    %31 = vector.load %arg6[%30, %c128] : memref<8x1536xf32, #tpu.memory_space<vmem>>, vector<8x128xf32>
    %cst_10 = arith.constant 0.0883883461 : f32
    %32 = vector.broadcast %cst_10 : f32 to vector<8x128xf32>
    %33 = arith.mulf %31, %32 : vector<8x128xf32>
    %34 = arith.truncf %33 : vector<8x128xf32> to vector<8x128xbf16>
    %c0_11 = arith.constant 0 : index
    %c640 = arith.constant 640 : index
    %35 = vector.load %arg6[%c0_11, %c640] : memref<8x1536xf32, #tpu.memory_space<vmem>>, vector<8x128xf32>
    %36 = arith.truncf %35 : vector<8x128xf32> to vector<8x128xbf16>
    %c0_12 = arith.constant 0 : index
    %c1152 = arith.constant 1152 : index
    %37 = vector.load %arg6[%c0_12, %c1152] : memref<8x1536xf32, #tpu.memory_space<vmem>>, vector<8x128xf32>
    %38 = arith.truncf %37 : vector<8x128xf32> to vector<8x128xbf16>
    %cst_13 = arith.constant dense<0.000000e+00> : vector<8x8xf32>
    %39 = tpu.matmul %34, %36, %cst_13 {dimension_numbers = #tpu.dot_dimension_numbers<[1], [1], [0], [0], [0, 0, 1, 0], [], []>} : vector<8x128xbf16>, vector<8x128xbf16>, vector<8x8xf32> -> vector<8x8xf32>
    %cst_14 = arith.constant dense<0xFF800000> : vector<8xf32>
    %40 = vector.multi_reduction <maximumf>, %39, %cst_14 [1] : vector<8x8xf32> to vector<8xf32>
    %41 = vector.shape_cast %40 : vector<8xf32> to vector<8x1xf32>
    %42 = vector.broadcast %41 : vector<8x1xf32> to vector<8x8xf32>
    %43 = arith.subf %39, %42 : vector<8x8xf32>
    %44 = math.exp %43 : vector<8x8xf32>
    %cst_15 = arith.constant dense<0.000000e+00> : vector<8xf32>
    %45 = vector.multi_reduction <add>, %44, %cst_15 [1] : vector<8x8xf32> to vector<8xf32>
    %46 = vector.shape_cast %45 : vector<8xf32> to vector<8x1xf32>
    %47 = tpu.reciprocal %46 {approx = true} : vector<8x1xf32> -> vector<8x1xf32>
    %48 = vector.broadcast %47 : vector<8x1xf32> to vector<8x8xf32>
    %49 = arith.mulf %44, %48 : vector<8x8xf32>
    %50 = arith.truncf %49 : vector<8x8xf32> to vector<8x8xbf16>
    %cst_16 = arith.constant dense<0.000000e+00> : vector<8x128xf32>
    %51 = tpu.matmul %50, %38, %cst_16 {dimension_numbers = #tpu.dot_dimension_numbers<[1], [0], [0], [1], [0, 0, 1, 1], [], []>} : vector<8x8xbf16>, vector<8x128xbf16>, vector<8x128xf32> -> vector<8x128xf32>
    %c0_17 = arith.constant 0 : index
    %c0_18 = arith.constant 0 : index
    %c128_19 = arith.constant 128 : index
    %52 = vector.load %arg5[%c0_17, %c0_18, %c128_19] : memref<1x8x512xf32, #tpu.memory_space<vmem>>, vector<1x8x128xf32>
    %53 = vector.shape_cast %52 : vector<1x8x128xf32> to vector<8x128xf32>
    %54 = vector.shape_cast %51 : vector<8x128xf32> to vector<1x8x128xf32>
    tpu.vector_store %arg5[%c0_17, %c0_18, %c128_19], %54 {strides = array<i32>} : memref<1x8x512xf32, #tpu.memory_space<vmem>>, vector<1x8x128xf32>,
    %55 = arith.index_cast %4 : i32 to index
    %c256 = arith.constant 256 : index
    %56 = vector.load %arg6[%55, %c256] : memref<8x1536xf32, #tpu.memory_space<vmem>>, vector<8x128xf32>
    %cst_20 = arith.constant 0.0883883461 : f32
    %57 = vector.broadcast %cst_20 : f32 to vector<8x128xf32>
    %58 = arith.mulf %56, %57 : vector<8x128xf32>
    %59 = arith.truncf %58 : vector<8x128xf32> to vector<8x128xbf16>
    %c0_21 = arith.constant 0 : index
    %c768 = arith.constant 768 : index
    %60 = vector.load %arg6[%c0_21, %c768] : memref<8x1536xf32, #tpu.memory_space<vmem>>, vector<8x128xf32>
    %61 = arith.truncf %60 : vector<8x128xf32> to vector<8x128xbf16>
    %c0_22 = arith.constant 0 : index
    %c1280 = arith.constant 1280 : index
    %62 = vector.load %arg6[%c0_22, %c1280] : memref<8x1536xf32, #tpu.memory_space<vmem>>, vector<8x128xf32>
    %63 = arith.truncf %62 : vector<8x128xf32> to vector<8x128xbf16>
    %cst_23 = arith.constant dense<0.000000e+00> : vector<8x8xf32>
    %64 = tpu.matmul %59, %61, %cst_23 {dimension_numbers = #tpu.dot_dimension_numbers<[1], [1], [0], [0], [0, 0, 1, 0], [], []>} : vector<8x128xbf16>, vector<8x128xbf16>, vector<8x8xf32> -> vector<8x8xf32>
    %cst_24 = arith.constant dense<0xFF800000> : vector<8xf32>
    %65 = vector.multi_reduction <maximumf>, %64, %cst_24 [1] : vector<8x8xf32> to vector<8xf32>
    %66 = vector.shape_cast %65 : vector<8xf32> to vector<8x1xf32>
    %67 = vector.broadcast %66 : vector<8x1xf32> to vector<8x8xf32>
    %68 = arith.subf %64, %67 : vector<8x8xf32>
    %69 = math.exp %68 : vector<8x8xf32>
    %cst_25 = arith.constant dense<0.000000e+00> : vector<8xf32>
    %70 = vector.multi_reduction <add>, %69, %cst_25 [1] : vector<8x8xf32> to vector<8xf32>
    %71 = vector.shape_cast %70 : vector<8xf32> to vector<8x1xf32>
    %72 = tpu.reciprocal %71 {approx = true} : vector<8x1xf32> -> vector<8x1xf32>
    %73 = vector.broadcast %72 : vector<8x1xf32> to vector<8x8xf32>
    %74 = arith.mulf %69, %73 : vector<8x8xf32>
    %75 = arith.truncf %74 : vector<8x8xf32> to vector<8x8xbf16>
    %cst_26 = arith.constant dense<0.000000e+00> : vector<8x128xf32>
    %76 = tpu.matmul %75, %63, %cst_26 {dimension_numbers = #tpu.dot_dimension_numbers<[1], [0], [0], [1], [0, 0, 1, 1], [], []>} : vector<8x8xbf16>, vector<8x128xbf16>, vector<8x128xf32> -> vector<8x128xf32>
    %c0_27 = arith.constant 0 : index
    %c0_28 = arith.constant 0 : index
    %c256_29 = arith.constant 256 : index
    %77 = vector.load %arg5[%c0_27, %c0_28, %c256_29] : memref<1x8x512xf32, #tpu.memory_space<vmem>>, vector<1x8x128xf32>
    %78 = vector.shape_cast %77 : vector<1x8x128xf32> to vector<8x128xf32>
    %79 = vector.shape_cast %76 : vector<8x128xf32> to vector<1x8x128xf32>
    tpu.vector_store %arg5[%c0_27, %c0_28, %c256_29], %79 {strides = array<i32>} : memref<1x8x512xf32, #tpu.memory_space<vmem>>, vector<1x8x128xf32>,
    %80 = arith.index_cast %4 : i32 to index
    %c384 = arith.constant 384 : index
    %81 = vector.load %arg6[%80, %c384] : memref<8x1536xf32, #tpu.memory_space<vmem>>, vector<8x128xf32>
    %cst_30 = arith.constant 0.0883883461 : f32
    %82 = vector.broadcast %cst_30 : f32 to vector<8x128xf32>
    %83 = arith.mulf %81, %82 : vector<8x128xf32>
    %84 = arith.truncf %83 : vector<8x128xf32> to vector<8x128xbf16>
    %c0_31 = arith.constant 0 : index
    %c896 = arith.constant 896 : index
    %85 = vector.load %arg6[%c0_31, %c896] : memref<8x1536xf32, #tpu.memory_space<vmem>>, vector<8x128xf32>
    %86 = arith.truncf %85 : vector<8x128xf32> to vector<8x128xbf16>
    %c0_32 = arith.constant 0 : index
    %c1408 = arith.constant 1408 : index
    %87 = vector.load %arg6[%c0_32, %c1408] : memref<8x1536xf32, #tpu.memory_space<vmem>>, vector<8x128xf32>
    %88 = arith.truncf %87 : vector<8x128xf32> to vector<8x128xbf16>
    %cst_33 = arith.constant dense<0.000000e+00> : vector<8x8xf32>
    %89 = tpu.matmul %84, %86, %cst_33 {dimension_numbers = #tpu.dot_dimension_numbers<[1], [1], [0], [0], [0, 0, 1, 0], [], []>} : vector<8x128xbf16>, vector<8x128xbf16>, vector<8x8xf32> -> vector<8x8xf32>
    %cst_34 = arith.constant dense<0xFF800000> : vector<8xf32>
    %90 = vector.multi_reduction <maximumf>, %89, %cst_34 [1] : vector<8x8xf32> to vector<8xf32>
    %91 = vector.shape_cast %90 : vector<8xf32> to vector<8x1xf32>
    %92 = vector.broadcast %91 : vector<8x1xf32> to vector<8x8xf32>
    %93 = arith.subf %89, %92 : vector<8x8xf32>
    %94 = math.exp %93 : vector<8x8xf32>
    %cst_35 = arith.constant dense<0.000000e+00> : vector<8xf32>
    %95 = vector.multi_reduction <add>, %94, %cst_35 [1] : vector<8x8xf32> to vector<8xf32>
    %96 = vector.shape_cast %95 : vector<8xf32> to vector<8x1xf32>
    %97 = tpu.reciprocal %96 {approx = true} : vector<8x1xf32> -> vector<8x1xf32>
    %98 = vector.broadcast %97 : vector<8x1xf32> to vector<8x8xf32>
    %99 = arith.mulf %94, %98 : vector<8x8xf32>
    %100 = arith.truncf %99 : vector<8x8xf32> to vector<8x8xbf16>
    %cst_36 = arith.constant dense<0.000000e+00> : vector<8x128xf32>
    %101 = tpu.matmul %100, %88, %cst_36 {dimension_numbers = #tpu.dot_dimension_numbers<[1], [0], [0], [1], [0, 0, 1, 1], [], []>} : vector<8x8xbf16>, vector<8x128xbf16>, vector<8x128xf32> -> vector<8x128xf32>
    %c0_37 = arith.constant 0 : index
    %c0_38 = arith.constant 0 : index
    %c384_39 = arith.constant 384 : index
    %102 = vector.load %arg5[%c0_37, %c0_38, %c384_39] : memref<1x8x512xf32, #tpu.memory_space<vmem>>, vector<1x8x128xf32>
    %103 = vector.shape_cast %102 : vector<1x8x128xf32> to vector<8x128xf32>
    %104 = vector.shape_cast %101 : vector<8x128xf32> to vector<1x8x128xf32>
    tpu.vector_store %arg5[%c0_37, %c0_38, %c384_39], %104 {strides = array<i32>} : memref<1x8x512xf32, #tpu.memory_space<vmem>>, vector<1x8x128xf32>,
    return
  }
  func.func @transform_0(%arg0: i32, %arg1: i32) -> (i32, i32, i32) {
    %c0_i32 = arith.constant 0 : i32
    %c0_i32_0 = arith.constant 0 : i32
    %c0_i32_1 = arith.constant 0 : i32
    return %arg0, %c0_i32, %c0_i32_0 : i32, i32, i32
  }
  func.func @transform_1(%arg0: i32, %arg1: i32) -> (i32, i32) {
    %c0_i32 = arith.constant 0 : i32
    %c0_i32_0 = arith.constant 0 : i32
    %c0_i32_1 = arith.constant 0 : i32
    return %c0_i32, %c0_i32_0 : i32, i32
  }
  func.func @transform_2(%arg0: i32, %arg1: i32) -> (i32, i32) {
    %c0_i32 = arith.constant 0 : i32
    %c0_i32_0 = arith.constant 0 : i32
    %c0_i32_1 = arith.constant 0 : i32
    return %c0_i32, %c0_i32_0 : i32, i32
  }
  func.func @transform_3(%arg0: i32, %arg1: i32) -> (i32, i32, i32) {
    %c0_i32 = arith.constant 0 : i32
    %c0_i32_0 = arith.constant 0 : i32
    return %arg0, %arg1, %c0_i32 : i32, i32, i32
  }
}

</mosaic_0001>

<bundles_post_ra>
// kernel: tpu_custom_call.1
= control target key start
LH: loop header
LB: loop body
LE: loop exit
PB: predicated region body
PF: predicated region fallthrough
CT: control target
= control target key end

     0   :  { %8 = vsyncpa [#allocation4], 0  ;;  %s5460_s0 = inlined_call_operand.hbm [shape: bf16[2,8,512], index: 0, kind: input, shape index: {}]   ;;  %s5461_s1 = inlined_call_operand.hbm [shape: bf16[512,1536], index: 1, kind: input, shape index: {}]   ;;  %s5462_s2 = inlined_call_operand.hbm [shape: f32[1,1536], index: 2, kind: input, shape index: {}]   ;;  %s5463_s3 = inlined_call_operand.hbm [shape: f32[2,8,512], index: 3, kind: output, shape index: {}]  }
   0x1   :  { %10 = vsyncpa [#allocation4 + $0x1], 0 }
   0x2   :  { %11 = vsyncpa [#allocation7], 0 }
   0x3   :  { %12 = vsyncpa [#allocation5], 0 }
   0x4   :  { %14 = vsyncpa [#allocation5 + $0x1], 0  ;;  %s5070_s12 = smov 0   ;;  %s5072_s13 = smov 0  }
   0x5   :  { %s5074_s14 = smov 0   ;;  %s5076_s15 = smov 0  }
   0x6   :  { %s5078_s16 = smov 0   ;;  %s5080_s17 = smov 0  }
   0x7 LB: > { %s3672_s18 = sadd.s32 4294967295, %s5040_s17   ;;  %s3673_s19 = sadd.s32 4294967294, %s5040_s17   ;;  %s5040_s17 = sphi %s5080_s17, %s20_s17   ;;  %s5036_s16 = sphi %s5078_s16, %s5485_s16   ;;  %s5032_s15 = sphi %s5076_s15, %s5484_s15   ;;  %s5028_s14 = sphi %s5074_s14, %s5483_s14   ;;  %s5024_s13 = sphi %s5072_s13, %s5482_s13   ;;  %s5020_s12 = sphi %s5070_s12, %s5481_s12  }
   0x8   : > { %p52_p0 = scmp.ne.s32.totalorder %s5024_s13, %s5020_s12  ;;  %p5104_p1 = scmp.eq.s32.totalorder %s3672_s18, 0 }
   0x9   : > { %p5108_p2 = scmp.eq.s32.totalorder %s3672_s18, 1  ;;  %p126_p3 = scmp.eq.s32.totalorder %s3673_s19, 1 }
   0xa   : > { %s5468_s20 = scalar_select %p5104_p1, 1, 0 }
   0xb   : > { %p5114_p4 = por %p5104_p1, %p52_p0  ;;  %p3674_p5 = scmp.ge.s32.totalorder %s5040_s17, 1 }
   0xc   : > { %p5119_p6 = por %p126_p3, %p52_p0  ;;  %p133_p7 = scmp.lt.s32.totalorder %s5040_s17, 3 }
   0xd   : > { %s5470_s22 = scalar_select %p5114_p4, 1, 0 }
   0xe   : > { %s5471_s23 = scalar_select %p5119_p6, 1, 0 }
   0xf   : > { %p5124_p8 = pnand %p3674_p5, %p133_p7  ;;  %s5042_s25 = smov [#allocation6]  }
  0x10   : > { %s145_s26 = sshll.u32 %s5042_s25, 4  ;;  %s5043_s28 = smov [#allocation8]   ;;  %s5128_s26 = int_to_ptr.vmem [resolvable:$true] %s145_s26 }
  0x11   : > { %p4197_p9 = pneg %p5124_p8  ;;  %s159_s29 = sshll.u32 %s5043_s28, 4  ;;  %s5139_s29 = int_to_ptr.vmem [resolvable:$true] %s159_s29 }
  0x12   : > { %s4868_s5 = scalar_lea.hbm %s5461_s1, 49152 }
  0x13   : > { %p5135_p11 = pnand %p4197_p9, %p5104_p1  ;;  %p4869_p12 = scmp.ne.s32.totalorder %s5461_s1, %s4868_s5 }
  0x14   : > { %p4875_p5 = scmp.lt.u32.totalorder %s4868_s5, %s5461_s1 }
  0x15   : > { %p4870_p13 = pneg %p5135_p11 }
  0x17   : > { %p4871_p0 = pnand %p4870_p13, %p4869_p12 }
  0x19   : > { %p4872_p3 = pneg %p4871_p0 }
  0x1b   : > { %p4877_p7 = pnand %p4875_p5, %p4872_p3 }
  0x1d   : > { %4880 = shalt.err (!%p4877_p7)
}
  0x1e   : > { %s4881_s10 = scalar_lea.vmem %s5128_s26, 49152  ;;  %p4889_p1 = scmp.lt.s32.totalorder %s5128_s26, %s5128_s26 }
  0x1f   : > { %p4882_p9 = scmp.ne.s32.totalorder %s5128_s26, %s4881_s10  ;;  %p4890_p12 = scmp.lt.s32.totalorder %s4881_s10, %s4881_s10 }
  0x21   : > { %p4884_p10 = pnand %p4882_p9, %p4870_p13  ;;  %p4891_p0 = por %p4890_p12, %p4889_p1 }
  0x23   : > { %p4885_p6 = pneg %p4884_p10 }
  0x25   : > { %p4892_p4 = pnand %p4891_p0, %p4885_p6 }
  0x27   : > { %4895 = shalt.err (!%p4892_p4)
}
  0x28   : > { %s5044_s11 = smov 768   ;;  %s5045_s18 = smov 48  }
  0x29   : > { %4200 = dma.hbm_to_vmem [thread:$0]  (!%p5135_p11), %s5461_s1, 49152, %s5128_s26, [#allocation7], %s5044_s11, %s5044_s11, %s5045_s18  }
  0x2a   : > { %s4896_s4 = scalar_lea.hbm %s5462_s2, 192 }
  0x2b   : > { %p4897_p1 = scmp.ne.s32.totalorder %s5462_s2, %s4896_s4  ;;  %p4903_p10 = scmp.lt.u32.totalorder %s4896_s4, %s5462_s2 }
  0x2d   : > { %p4899_p4 = pnand %p4897_p1, %p4870_p13 }
  0x2f   : > { %p4900_p6 = pneg %p4899_p4 }
  0x31   : > { %p4905_p3 = pnand %p4903_p10, %p4900_p6 }
  0x33   : > { %4908 = shalt.err (!%p4905_p3)
}
  0x34   : > { %s4909_s26 = scalar_lea.vmem %s5139_s29, 192  ;;  %p4917_p12 = scmp.lt.s32.totalorder %s5139_s29, %s5139_s29 }
  0x35   : > { %p4910_p5 = scmp.ne.s32.totalorder %s5139_s29, %s4909_s26  ;;  %p4918_p0 = scmp.lt.s32.totalorder %s4909_s26, %s4909_s26 }
  0x37   : > { %p4912_p7 = pnand %p4910_p5, %p4870_p13  ;;  %p4919_p1 = por %p4918_p0, %p4917_p12 }
  0x39   : > { %p4913_p9 = pneg %p4912_p7 }
  0x3b   : > { %p4920_p4 = pnand %p4919_p1, %p4913_p9 }
  0x3d   : > { %4923 = shalt.err (!%p4920_p4)
}
  0x3e   : > { %4203 = dma.hbm_to_vmem [thread:$0]  (!%p5135_p11), %s5462_s2, 192, %s5139_s29, [#allocation7]  }
  0x3f   : > { %s32_s11 = sadd.s32 1, %s5036_s16  ;;  %s39_s18 = sadd.s32 1, %s5028_s14 }
  0x40   : > { %p34_p13 = scmp.ge.s32.totalorder %s32_s11, 2  ;;  %p46_p6 = scmp.ne.s32.totalorder %s5028_s14, %s5024_s13 }
  0x41   : > { %p47_p10 = scmp.eq.s32.totalorder %s5040_s17, 0  ;;  %p4214_p3 = scmp.lt.s32.totalorder %s5040_s17, 2 }
  0x42   : > { %s5487_s11 = smov (%p34_p13, %s32_s11), 0  ;;  %p5203_p7 = por %p5108_p2, %p46_p6 }
  0x43   : > { %p48_p5 = por %p47_p10, %p46_p6  ;;  %s36_s19 = ssub.s32 %s5036_s16, %s5487_s11 }
  0x44   : > { %s5474_s27 = scalar_select %p5203_p7, 1, 0 }
  0x45   : > { %s170_s25 = sand.u32 1, %s5028_s14   ;;  %p37_p9 = scmp.eq.s32.totalorder %s36_s19, 0 }
  0x46   : > { %s3678_s29 = sshll.u32 %s170_s25, 4  ;;  %s4083_s28 = sshll.u32 %s5036_s16, 8 }
  0x47   : > { %s5212_s30 = scalar_select %p37_p9, %s5028_s14, %s39_s18  }
  0x48   : > { %s5217_s6 = scalar_lea.hbm %s5460_s0, %s4083_s28  ;;  %s174_s21 = scalar_lea.vmem [#allocation3], %s3678_s29 }
  0x49   : > { %s182_s7 = sshll.u32 %s174_s21, 4  ;;  %p5221_p2 = pnand %p4214_p3, %p48_p5  ;;  %s5225_s7 = int_to_ptr.vmem [resolvable:$true] %s182_s7 }
  0x4a   : > { %s171_s26 = scalar_lea.sflag [#allocation4], %s170_s25  ;;  %s4924_s9 = scalar_lea.hbm %s5217_s6, 256 }
  0x4b   : > { %p4925_p11 = scmp.ne.s32.totalorder %s5217_s6, %s4924_s9  ;;  %p4926_p12 = pneg %p5221_p2 }
  0x4c   : > { %s4929_s19 = scalar_lea.hbm %s5460_s0, 512  ;;  %p4930_p4 = scmp.lt.u32.totalorder %s5217_s6, %s5460_s0 }
  0x4d   : > { %p4927_p0 = pnand %p4926_p12, %p4925_p11  ;;  %p4931_p13 = scmp.lt.u32.totalorder %s4929_s19, %s4924_s9 }
  0x4e   : > { %p4933_p10 = scmp.lt.u32.totalorder %s4924_s9, %s5217_s6 }
  0x4f   : > { %p4928_p1 = pneg %p4927_p0  ;;  %p4932_p6 = por %p4931_p13, %p4930_p4 }
  0x51   : > { %p4934_p3 = por %p4933_p10, %p4932_p6 }
  0x53   : > { %p4935_p5 = pnand %p4934_p3, %p4928_p1 }
  0x55   : > { %4938 = shalt.err (!%p4935_p5)
}
  0x56   : > { %s4939_s25 = scalar_lea.vmem %s5225_s7, 256  ;;  %s5046_s4 = smov [#allocation3]  }
  0x57   : > { %p4940_p9 = scmp.ne.s32.totalorder %s5225_s7, %s4939_s25  ;;  %s4944_s5 = sshll.u32 %s5046_s4, 4  ;;  %s4945_s5 = int_to_ptr.vmem [resolvable:$false] %s4944_s5 }
  0x58   : > { %s4946_s21 = scalar_lea.vmem %s4945_s5, 512  ;;  %p4947_p7 = scmp.lt.s32.totalorder %s5225_s7, %s4945_s5 }
  0x59   : > { %p4942_p11 = pnand %p4940_p9, %p4926_p12  ;;  %p4948_p4 = scmp.lt.s32.totalorder %s4946_s21, %s4939_s25 }
  0x5b   : > { %p4943_p0 = pneg %p4942_p11  ;;  %p4949_p13 = por %p4948_p4, %p4947_p7 }
  0x5d   : > { %p4950_p6 = pnand %p4949_p13, %p4943_p0 }
  0x5f   : > { %4953 = shalt.err (!%p4950_p6)
}
  0x60   : > { %4207 = dma.hbm_to_vmem [thread:$0]  (!%p5221_p2), %s5217_s6, 256, %s5225_s7, %s171_s26  }
  0x61   : > { %191 = sbr.rel (%p5124_p8) target bundleno = 1367 (0x557), region = 32  ;;  %s5255_s9 = sand.u32 (!%p5124_p8), 1, %s5024_s13  }
  0x62   : > { %s3682_s10 = sshll.u32 (!%p5124_p8), %s5255_s9, 4  ;;  %s194_s18 = scalar_lea.sflag (!%p5124_p8), [#allocation4], %s5255_s9 }
  0x63   : > { %s5259_s19 = scalar_lea.vmem (!%p5124_p8), [#allocation3], %s3682_s10  ;;  %p5476_p7 = scmp.ne.s32.totalorder (!%p5124_p8), %s5470_s22, 0 }
  0x68   : > { %5007 = dma.done.wait (%p5476_p7), %s194_s18, 256  }
  0x69   : > { %5009 = vsyncadd (%p5476_p7), %s194_s18, 4294967040  ;;  %p5477_p2 = scmp.ne.s32.totalorder %s5468_s20, 0 }
  0x6b   : > { %5011 = dma.done.wait (%p5477_p2), [#allocation7], 49344  }
  0x6c   : > { %5013 = vsyncadd (%p5477_p2), [#allocation7], 4294917952  ;;  %v4272_v0 = vld [vmem:[#allocation6 + $0x4] ss:$48 sps:$4 sm:$0xff]   ;;  %v4274_v1 = vld [vmem:[#allocation6 + $0xc] ss:$48 sps:$4 sm:$0xff]  }
  0x6d   : > { %2617 = vmatprep.subr.bf16.mxu0 %v4272_v0  ;;  %v4276_v2 = vld [vmem:[#allocation6] ss:$48 sps:$4 sm:$0xff]   ;;  %v4277_v3 = vld [vmem:[#allocation6 + $0x8] ss:$48 sps:$4 sm:$0xff]   ;;  %2699 = vmatprep.subr.bf16.mxu1 %v4274_v1  ;;  %v4278_v4 = vld [vmem:[#allocation6 + $0x64] ss:$48 sps:$4 sm:$0xff]  }
  0x6e   : > { %2618 = vmatpush1.bf16.msra.mxu0 %v4276_v2  ;;  %2700 = vmatpush1.bf16.msra.mxu1 %v4277_v3  ;;  %v4280_v5 = vld [vmem:[#allocation6 + $0x6c] ss:$48 sps:$4 sm:$0xff]   ;;  %v4282_v6 = vld [vmem:[#allocation6 + $0x60] ss:$48 sps:$4 sm:$0xff]   ;;  %v4283_v7 = vld [vmem:[#allocation6 + $0x68] ss:$48 sps:$4 sm:$0xff]  }
  0x6f   : > { %2619 = vmatprep.subr.bf16.mxu0 %v4278_v4  ;;  %2701 = vmatprep.subr.bf16.mxu1 %v4280_v5  ;;  %v4284_v8 = vld [vmem:[#allocation6 + $0xc4] ss:$48 sps:$4 sm:$0xff]   ;;  %v4286_v9 = vld [vmem:[#allocation6 + $0xcc] ss:$48 sps:$4 sm:$0xff]   ;;  %v4288_v10 = vld [vmem:[#allocation6 + $0xc0] ss:$48 sps:$4 sm:$0xff]  }
  0x70   : > { %v4289_v11 = vld [vmem:[#allocation6 + $0xc8] ss:$48 sps:$4 sm:$0xff]   ;;  %v4290_v12 = vld [vmem:[#allocation6 + $0x124] ss:$48 sps:$4 sm:$0xff]   ;;  %v4292_v13 = vld [vmem:[#allocation6 + $0x12c] ss:$48 sps:$4 sm:$0xff]  }
  0x71   : > { %v4294_v14 = vld [vmem:[#allocation6 + $0x120] ss:$48 sps:$4 sm:$0xff]   ;;  %v4295_v15 = vld [vmem:[#allocation6 + $0x128] ss:$48 sps:$4 sm:$0xff]   ;;  %v4296_v16 = vld [vmem:[#allocation6 + $0x184] ss:$48 sps:$4 sm:$0xff]  }
  0x72   : > { %2620 = vmatpush1.bf16.msra.mxu0 %v4282_v6  ;;  %2702 = vmatpush1.bf16.msra.mxu1 %v4283_v7  ;;  %v4298_v17 = vld [vmem:[#allocation6 + $0x18c] ss:$48 sps:$4 sm:$0xff]   ;;  %v4300_v18 = vld [vmem:[#allocation6 + $0x180] ss:$48 sps:$4 sm:$0xff]   ;;  %v4301_v19 = vld [vmem:[#allocation6 + $0x188] ss:$48 sps:$4 sm:$0xff]  }
  0x73   : > { %2621 = vmatprep.subr.bf16.mxu0 %v4284_v8  ;;  %2703 = vmatprep.subr.bf16.mxu1 %v4286_v9  ;;  %v4302_v20 = vld [vmem:[#allocation6 + $0x1e4] ss:$48 sps:$4 sm:$0xff]   ;;  %v4304_v21 = vld [vmem:[#allocation6 + $0x1ec] ss:$48 sps:$4 sm:$0xff]   ;;  %v4306_v22 = vld [vmem:[#allocation6 + $0x1e0] ss:$48 sps:$4 sm:$0xff]  }
  0x74   : > { %v4307_v23 = vld [vmem:[#allocation6 + $0x1e8] ss:$48 sps:$4 sm:$0xff]   ;;  %v4308_v24 = vld [vmem:[#allocation6 + $0x244] ss:$48 sps:$4 sm:$0xff]   ;;  %v4310_v25 = vld [vmem:[#allocation6 + $0x24c] ss:$48 sps:$4 sm:$0xff]  }
  0x75   : > { %v4312_v26 = vld [vmem:[#allocation6 + $0x240] ss:$48 sps:$4 sm:$0xff]   ;;  %v4313_v27 = vld [vmem:[#allocation6 + $0x248] ss:$48 sps:$4 sm:$0xff]   ;;  %v4314_v28 = vld [vmem:[#allocation6 + $0x2a4] ss:$48 sps:$4 sm:$0xff]  }
  0x76   : > { %2622 = vmatpush1.bf16.msra.mxu0 %v4288_v10  ;;  %2704 = vmatpush1.bf16.msra.mxu1 %v4289_v11  ;;  %v4316_v29 = vld [vmem:[#allocation6 + $0x2ac] ss:$48 sps:$4 sm:$0xff]   ;;  %v4318_v30 = vld [vmem:[#allocation6 + $0x2a0] ss:$48 sps:$4 sm:$0xff]   ;;  %v4319_v31 = vld [vmem:[#allocation6 + $0x2a8] ss:$48 sps:$4 sm:$0xff]  }
  0x77   : > { %2623 = vmatprep.subr.bf16.mxu0 %v4290_v12  ;;  %2705 = vmatprep.subr.bf16.mxu1 %v4292_v13  ;;  %v4320_v32 = vld [vmem:[#allocation6 + $0x304] ss:$48 sps:$4 sm:$0xff]   ;;  %v4322_v33 = vld [vmem:[#allocation6 + $0x30c] ss:$48 sps:$4 sm:$0xff]   ;;  %v4324_v34 = vld [vmem:[#allocation6 + $0x300] ss:$48 sps:$4 sm:$0xff]  }
  0x78   : > { %v4325_v35 = vld [vmem:[#allocation6 + $0x308] ss:$48 sps:$4 sm:$0xff]   ;;  %v4326_v36 = vld [vmem:[#allocation6 + $0x364] ss:$48 sps:$4 sm:$0xff]   ;;  %v4328_v37 = vld [vmem:[#allocation6 + $0x36c] ss:$48 sps:$4 sm:$0xff]  }
  0x79   : > { %v4330_v38 = vld [vmem:[#allocation6 + $0x360] ss:$48 sps:$4 sm:$0xff]   ;;  %v4331_v39 = vld [vmem:[#allocation6 + $0x368] ss:$48 sps:$4 sm:$0xff]   ;;  %v4332_v40 = vld [vmem:[#allocation6 + $0x3c4] ss:$48 sps:$4 sm:$0xff]  }
  0x7a   : > { %2624 = vmatpush1.bf16.msra.mxu0 %v4294_v14  ;;  %2706 = vmatpush1.bf16.msra.mxu1 %v4295_v15  ;;  %v4334_v41 = vld [vmem:[#allocation6 + $0x3cc] ss:$48 sps:$4 sm:$0xff]   ;;  %v4336_v42 = vld [vmem:[#allocation6 + $0x3c0] ss:$48 sps:$4 sm:$0xff]   ;;  %v4337_v43 = vld [vmem:[#allocation6 + $0x3c8] ss:$48 sps:$4 sm:$0xff]  }
  0x7b   : > { %2625 = vmatprep.subr.bf16.mxu0 %v4296_v16  ;;  %2707 = vmatprep.subr.bf16.mxu1 %v4298_v17  ;;  %v4338_v44 = vld [vmem:[#allocation6 + $0x424] ss:$48 sps:$4 sm:$0xff]   ;;  %v4340_v45 = vld [vmem:[#allocation6 + $0x42c] ss:$48 sps:$4 sm:$0xff]   ;;  %v4342_v47 = vld [vmem:[#allocation6 + $0x420] ss:$48 sps:$4 sm:$0xff]  }
  0x7c   : > { %v233_v46 = vld [vmem:[%s5259_s19] sm:$0xff]  ;;  %v4343_v49 = vld [vmem:[#allocation6 + $0x428] ss:$48 sps:$4 sm:$0xff]   ;;  %v4346_v51 = vld [vmem:[#allocation6 + $0x48c] ss:$48 sps:$4 sm:$0xff]   ;;  %vm5048_vm0 = vmmov 0  }
  0x7d   : > { %v5270_v48 = vcombine.high %v233_v46, %v233_v46  ;;  %v4344_v50 = vld [vmem:[#allocation6 + $0x484] ss:$48 sps:$4 sm:$0xff]   ;;  %v4348_v52 = vld [vmem:[#allocation6 + $0x480] ss:$48 sps:$4 sm:$0xff]   ;;  %v4349_v53 = vld [vmem:[#allocation6 + $0x488] ss:$48 sps:$4 sm:$0xff]   ;;  %v5274_v5 = vcombine.low %v233_v46, %v233_v46 }
  0x7e   : > { %2626 = vmatpush1.bf16.msra.mxu0 %v4300_v18  ;;  %2708 = vmatpush1.bf16.msra.mxu1 %v4301_v19  ;;  %v4350_v54 = vld [vmem:[#allocation6 + $0x4e4] ss:$48 sps:$4 sm:$0xff]   ;;  %v4352_v55 = vld [vmem:[#allocation6 + $0x4ec] ss:$48 sps:$4 sm:$0xff]   ;;  %v4354_v56 = vld [vmem:[#allocation6 + $0x4e0] ss:$48 sps:$4 sm:$0xff]  }
  0x7f   : > { %2627 = vmatprep.subr.bf16.mxu0 %v4302_v20  ;;  %2709 = vmatprep.subr.bf16.mxu1 %v4304_v21  ;;  %v4355_v57 = vld [vmem:[#allocation6 + $0x4e8] ss:$48 sps:$4 sm:$0xff]   ;;  %v4356_v58 = vld [vmem:[#allocation6 + $0x544] ss:$48 sps:$4 sm:$0xff]   ;;  %v4358_v59 = vld [vmem:[#allocation6 + $0x54c] ss:$48 sps:$4 sm:$0xff]  }
  0x80   : > { %2649 = vmatprep.mubr.bf16.mxu0 %v5270_v48  ;;  %2731 = vmatprep.mubr.bf16.mxu1 %v5270_v48  ;;  %v4360_v60 = vld [vmem:[#allocation6 + $0x540] ss:$48 sps:$4 sm:$0xff]   ;;  %v4361_v61 = vld [vmem:[#allocation6 + $0x548] ss:$48 sps:$4 sm:$0xff]   ;;  %v4362_v62 = vld [vmem:[#allocation6 + $0x5a4] ss:$48 sps:$4 sm:$0xff]  }
  0x81   : > { %v4364_v63 = vld [vmem:[#allocation6 + $0x5ac] ss:$48 sps:$4 sm:$0xff]   ;;  %v4366_v0 = vld [vmem:[#allocation6 + $0x5a0] ss:$48 sps:$4 sm:$0xff]   ;;  %v4367_v1 = vld [vmem:[#allocation6 + $0x5a8] ss:$48 sps:$4 sm:$0xff]  }
  0x82   : > { %2628 = vmatpush1.bf16.msra.mxu0 %v4306_v22  ;;  %2710 = vmatpush1.bf16.msra.mxu1 %v4307_v23  ;;  %v4371_v2 = vld [vmem:[#allocation6 + $0x604] ss:$48 sps:$4 sm:$0xff]   ;;  %v4374_v3 = vld [vmem:[#allocation6 + $0x60c] ss:$48 sps:$4 sm:$0xff]   ;;  %v4369_v4 = vld [vmem:[#allocation6 + $0x600] ss:$48 sps:$4 sm:$0xff]  }
  0x83   : > { %2629 = vmatprep.subr.bf16.mxu0 %v4308_v24  ;;  %2711 = vmatprep.subr.bf16.mxu1 %v4310_v25  ;;  %v4372_v6 = vld [vmem:[#allocation6 + $0x608] ss:$48 sps:$4 sm:$0xff]   ;;  %v4378_v7 = vld [vmem:[#allocation6 + $0x664] ss:$48 sps:$4 sm:$0xff]   ;;  %v4381_v8 = vld [vmem:[#allocation6 + $0x66c] ss:$48 sps:$4 sm:$0xff]  }
  0x84   : > { %v4376_v9 = vld [vmem:[#allocation6 + $0x660] ss:$48 sps:$4 sm:$0xff]   ;;  %v4379_v10 = vld [vmem:[#allocation6 + $0x668] ss:$48 sps:$4 sm:$0xff]   ;;  %v4384_v11 = vld [vmem:[#allocation6 + $0x6c4] ss:$48 sps:$4 sm:$0xff]  }
  0x85   : > { %v4387_v12 = vld [vmem:[#allocation6 + $0x6cc] ss:$48 sps:$4 sm:$0xff]   ;;  %v4382_v13 = vld [vmem:[#allocation6 + $0x6c0] ss:$48 sps:$4 sm:$0xff]   ;;  %v4385_v14 = vld [vmem:[#allocation6 + $0x6c8] ss:$48 sps:$4 sm:$0xff]  }
  0x86   : > { %2630 = vmatpush1.bf16.msra.mxu0 %v4312_v26  ;;  %2712 = vmatpush1.bf16.msra.mxu1 %v4313_v27  ;;  %v4390_v15 = vld [vmem:[#allocation6 + $0x724] ss:$48 sps:$4 sm:$0xff]   ;;  %v4393_v16 = vld [vmem:[#allocation6 + $0x72c] ss:$48 sps:$4 sm:$0xff]   ;;  %v4388_v17 = vld [vmem:[#allocation6 + $0x720] ss:$48 sps:$4 sm:$0xff]  }
  0x87   : > { %2631 = vmatprep.subr.bf16.mxu0 %v4314_v28  ;;  %2713 = vmatprep.subr.bf16.mxu1 %v4316_v29  ;;  %v4391_v18 = vld [vmem:[#allocation6 + $0x728] ss:$48 sps:$4 sm:$0xff]   ;;  %v4396_v19 = vld [vmem:[#allocation6 + $0x784] ss:$48 sps:$4 sm:$0xff]   ;;  %v4399_v20 = vld [vmem:[#allocation6 + $0x78c] ss:$48 sps:$4 sm:$0xff]  }
  0x88   : > { %v4394_v21 = vld [vmem:[#allocation6 + $0x780] ss:$48 sps:$4 sm:$0xff]   ;;  %v4397_v22 = vld [vmem:[#allocation6 + $0x788] ss:$48 sps:$4 sm:$0xff]   ;;  %v4402_v23 = vld [vmem:[#allocation6 + $0x7e4] ss:$48 sps:$4 sm:$0xff]  }
  0x89   : > { %v4405_v24 = vld [vmem:[#allocation6 + $0x7ec] ss:$48 sps:$4 sm:$0xff]   ;;  %v4400_v25 = vld [vmem:[#allocation6 + $0x7e0] ss:$48 sps:$4 sm:$0xff]   ;;  %v4403_v26 = vld [vmem:[#allocation6 + $0x7e8] ss:$48 sps:$4 sm:$0xff]  }
  0x8a   : > { %2632 = vmatpush1.bf16.msra.mxu0 %v4318_v30  ;;  %2714 = vmatpush1.bf16.msra.mxu1 %v4319_v31  ;;  %v4408_v27 = vld [vmem:[#allocation6 + $0x844] ss:$48 sps:$4 sm:$0xff]   ;;  %v4411_v28 = vld [vmem:[#allocation6 + $0x84c] ss:$48 sps:$4 sm:$0xff]   ;;  %v4406_v31 = vld [vmem:[#allocation6 + $0x840] ss:$48 sps:$4 sm:$0xff]  }
  0x8b   : > { %2633 = vmatprep.subr.bf16.mxu0 %v4320_v32  ;;  %2715 = vmatprep.subr.bf16.mxu1 %v4322_v33  ;;  %v5279_v29 = vld [vmem:[%s5259_s19 + $0x8] sm:$0xff]  ;;  %v4414_v33 = vld [vmem:[#allocation6 + $0x8a4] ss:$48 sps:$4 sm:$0xff]   ;;  %vm3190_vm1 = vcmask 1043456   ;;  %vm3174_vm2 = vcmask 64512   ;;  %s3685_s20 = sshll.u32 %s5255_s9, 5 }
  0x8c   : > { %v5283_v30 = vcombine.high %v5279_v29, %v5279_v29  ;;  %v4409_v32 = vld [vmem:[#allocation6 + $0x848] ss:$48 sps:$4 sm:$0xff]   ;;  %v4435_v46 = vld [vmem:[#allocation6 + $0x9cc] ss:$48 sps:$4 sm:$0xff]   ;;  %s227_s22 = scalar_lea.vmem [#allocation9], %s3685_s20  ;;  %s4084_s6 = sshll.u32 %s5032_s15, 9 }
  0x8d   : > { %s3570_s24 = sshll.u32 %s227_s22, 4  ;;  %s5413_s26 = scalar_lea.hbm %s5463_s3, %s4084_s6  ;;  %s5408_s24 = int_to_ptr.vmem [resolvable:$true] %s3570_s24 }
  0x8e   : > { %2634 = vmatpush1.bf16.msra.mxu0 %v4324_v34  ;;  %2716 = vmatpush1.bf16.msra.mxu1 %v4325_v35  ;;  %v4417_v34 = vld [vmem:[#allocation6 + $0x8ac] ss:$48 sps:$4 sm:$0xff]   ;;  %v4412_v35 = vld [vmem:[#allocation6 + $0x8a0] ss:$48 sps:$4 sm:$0xff]   ;;  %s3554_s29 = scalar_lea.sflag [#allocation5], %s5255_s9  ;;  %s4954_s28 = scalar_lea.vmem %s5408_s24, 512 }
  0x8f   : > { %2635 = vmatprep.subr.bf16.mxu0 %v4326_v36  ;;  %2717 = vmatprep.subr.bf16.mxu1 %v4328_v37  ;;  %v4415_v36 = vld [vmem:[#allocation6 + $0x8a8] ss:$48 sps:$4 sm:$0xff]   ;;  %v4420_v37 = vld [vmem:[#allocation6 + $0x904] ss:$48 sps:$4 sm:$0xff]   ;;  %p4955_p8 = scmp.ne.s32.totalorder %s5408_s24, %s4954_s28  ;;  %p5478_p12 = scmp.ne.s32.totalorder %s5474_s27, 0 }
  0x90   : > { %s5049_s15 = smov [#allocation9]  }
  0x91   : > { %p4956_p1 = pnand %p4955_p8, %p5478_p12  ;;  %s4958_s25 = sshll.u32 %s5049_s15, 4  ;;  %s4959_s25 = int_to_ptr.vmem [resolvable:$false] %s4958_s25 }
  0x92   : > { %2636 = vmatpush1.bf16.msra.mxu0 %v4330_v38  ;;  %2718 = vmatpush1.bf16.msra.mxu1 %v4331_v39  ;;  %v4423_v38 = vld [vmem:[#allocation6 + $0x90c] ss:$48 sps:$4 sm:$0xff]   ;;  %v4418_v39 = vld [vmem:[#allocation6 + $0x900] ss:$48 sps:$4 sm:$0xff]   ;;  %s4960_s4 = scalar_lea.vmem %s4959_s25, 1024  ;;  %p4961_p3 = scmp.lt.s32.totalorder %s5408_s24, %s4959_s25 }
  0x93   : > { %2637 = vmatprep.subr.bf16.mxu0 %v4332_v40  ;;  %2719 = vmatprep.subr.bf16.mxu1 %v4334_v41  ;;  %v4421_v40 = vld [vmem:[#allocation6 + $0x908] ss:$48 sps:$4 sm:$0xff]   ;;  %v4426_v41 = vld [vmem:[#allocation6 + $0x964] ss:$48 sps:$4 sm:$0xff]   ;;  %p4957_p10 = pneg %p4956_p1  ;;  %p4962_p5 = scmp.lt.s32.totalorder %s4960_s4, %s4954_s28 }
  0x95   : > { %p4963_p9 = por %p4962_p5, %p4961_p3 }
  0x96   : > { %2638 = vmatpush1.bf16.msra.mxu0 %v4336_v42  ;;  %2720 = vmatpush1.bf16.msra.mxu1 %v4337_v43  ;;  %v4429_v42 = vld [vmem:[#allocation6 + $0x96c] ss:$48 sps:$4 sm:$0xff]   ;;  %v4424_v43 = vld [vmem:[#allocation6 + $0x960] ss:$48 sps:$4 sm:$0xff]  }
  0x97   : > { %2639 = vmatprep.subr.bf16.mxu0 %v4338_v44  ;;  %2721 = vmatprep.subr.bf16.mxu1 %v4340_v45  ;;  %v4427_v44 = vld [vmem:[#allocation6 + $0x968] ss:$48 sps:$4 sm:$0xff]   ;;  %v4432_v45 = vld [vmem:[#allocation6 + $0x9c4] ss:$48 sps:$4 sm:$0xff]   ;;  %p4964_p11 = pnand %p4963_p9, %p4957_p10 }
  0x9a   : > { %2640 = vmatpush1.bf16.msra.mxu0 %v4342_v47  ;;  %2722 = vmatpush1.bf16.msra.mxu1 %v4343_v49  ;;  %v4430_v47 = vld [vmem:[#allocation6 + $0x9c0] ss:$48 sps:$4 sm:$0xff]   ;;  %v4433_v49 = vld [vmem:[#allocation6 + $0x9c8] ss:$48 sps:$4 sm:$0xff]  }
  0x9b   : > { %2641 = vmatprep.subr.bf16.mxu0 %v4344_v50  ;;  %2723 = vmatprep.subr.bf16.mxu1 %v4346_v51  ;;  %v4438_v50 = vld [vmem:[#allocation6 + $0xa24] ss:$48 sps:$4 sm:$0xff]   ;;  %v4441_v51 = vld [vmem:[#allocation6 + $0xa2c] ss:$48 sps:$4 sm:$0xff]  }
  0x9e   : > { %2642 = vmatpush1.bf16.msra.mxu0 %v4348_v52  ;;  %2724 = vmatpush1.bf16.msra.mxu1 %v4349_v53  ;;  %v4436_v52 = vld [vmem:[#allocation6 + $0xa20] ss:$48 sps:$4 sm:$0xff]   ;;  %v4439_v53 = vld [vmem:[#allocation6 + $0xa28] ss:$48 sps:$4 sm:$0xff]  }
  0x9f   : > { %2643 = vmatprep.subr.bf16.mxu0 %v4350_v54  ;;  %2725 = vmatprep.subr.bf16.mxu1 %v4352_v55  ;;  %v4444_v54 = vld [vmem:[#allocation6 + $0xa84] ss:$48 sps:$4 sm:$0xff]   ;;  %v4447_v55 = vld [vmem:[#allocation6 + $0xa8c] ss:$48 sps:$4 sm:$0xff]  }
  0xa2   : > { %2644 = vmatpush1.bf16.msra.mxu0 %v4354_v56  ;;  %2726 = vmatpush1.bf16.msra.mxu1 %v4355_v57  ;;  %v4442_v56 = vld [vmem:[#allocation6 + $0xa80] ss:$48 sps:$4 sm:$0xff]   ;;  %v4445_v57 = vld [vmem:[#allocation6 + $0xa88] ss:$48 sps:$4 sm:$0xff]  }
  0xa3   : > { %2645 = vmatprep.subr.bf16.mxu0 %v4356_v58  ;;  %2727 = vmatprep.subr.bf16.mxu1 %v4358_v59  ;;  %v4450_v58 = vld [vmem:[#allocation6 + $0xae4] ss:$48 sps:$4 sm:$0xff]   ;;  %v4453_v59 = vld [vmem:[#allocation6 + $0xaec] ss:$48 sps:$4 sm:$0xff]  }
  0xa6   : > { %2646 = vmatpush1.bf16.msra.mxu0 %v4360_v60  ;;  %2728 = vmatpush1.bf16.msra.mxu1 %v4361_v61  ;;  %v4448_v60 = vld [vmem:[#allocation6 + $0xae0] ss:$48 sps:$4 sm:$0xff]   ;;  %v4451_v61 = vld [vmem:[#allocation6 + $0xae8] ss:$48 sps:$4 sm:$0xff]  }
  0xa7   : > { %2647 = vmatprep.subr.bf16.mxu0 %v4362_v62  ;;  %2729 = vmatprep.subr.bf16.mxu1 %v4364_v63  ;;  %v4456_v62 = vld [vmem:[#allocation6 + $0xb44] ss:$48 sps:$4 sm:$0xff]   ;;  %v4459_v63 = vld [vmem:[#allocation6 + $0xb4c] ss:$48 sps:$4 sm:$0xff]  }
  0xaa   : > { %2648 = vmatpush1.bf16.msra.mxu0 %v4366_v0  ;;  %2730 = vmatpush1.bf16.msra.mxu1 %v4367_v1  ;;  %v4454_v0 = vld [vmem:[#allocation6 + $0xb40] ss:$48 sps:$4 sm:$0xff]   ;;  %v4457_v1 = vld [vmem:[#allocation6 + $0xb48] ss:$48 sps:$4 sm:$0xff]  }
  0xab   : > { %2658 = vmatprep.subr.bf16.mxu0 %v4371_v2  ;;  %2740 = vmatprep.subr.bf16.mxu1 %v4374_v3  ;;  %v4462_v2 = vld [vmem:[#allocation6 + $0xba4] ss:$48 sps:$4 sm:$0xff]   ;;  %v4465_v3 = vld [vmem:[#allocation6 + $0xbac] ss:$48 sps:$4 sm:$0xff]  }
  0xad   : > { %2650 = vmatmul.mubr.bf16.vlgmr.msra.gmra.mrb[0].mxu0 %v5274_v5  ;;  %2732 = vmatmul.mubr.bf16.vlgmr.msra.gmra.mrb[0].mxu1 %v5274_v5 }
  0xae   : > { %2659 = vmatpush1.bf16.msra.mxu0 %v4369_v4  ;;  %2741 = vmatpush1.bf16.msra.mxu1 %v4372_v6  ;;  %v4460_v4 = vld [vmem:[#allocation6 + $0xba0] ss:$48 sps:$4 sm:$0xff]   ;;  %v4463_v6 = vld [vmem:[#allocation6 + $0xba8] ss:$48 sps:$4 sm:$0xff]  }
  0xaf   : > { %2660 = vmatprep.subr.bf16.mxu0 %v4378_v7  ;;  %2742 = vmatprep.subr.bf16.mxu1 %v4381_v8  ;;  %v4470_v7 = vld [vmem:[#allocation6 + $0x14] ss:$48 sps:$4 sm:$0xff]   ;;  %v4473_v8 = vld [vmem:[#allocation6 + $0x1c] ss:$48 sps:$4 sm:$0xff]  }
  0xb0   : > { %2690 = vmatprep.mubr.bf16.mxu0 %v5283_v30  ;;  %2772 = vmatprep.mubr.bf16.mxu1 %v5283_v30 }
  0xb2   : > { %2661 = vmatpush1.bf16.msra.mxu0 %v4376_v9  ;;  %2743 = vmatpush1.bf16.msra.mxu1 %v4379_v10  ;;  %v5289_v9 = vcombine.low %v5279_v29, %v5279_v29  ;;  %v4468_v10 = vld [vmem:[#allocation6 + $0x10] ss:$48 sps:$4 sm:$0xff]   ;;  %v4503_v29 = vld [vmem:[#allocation6 + $0x1fc] ss:$48 sps:$4 sm:$0xff]  }
  0xb3   : > { %2662 = vmatprep.subr.bf16.mxu0 %v4384_v11  ;;  %2744 = vmatprep.subr.bf16.mxu1 %v4387_v12  ;;  %v4471_v11 = vld [vmem:[#allocation6 + $0x18] ss:$48 sps:$4 sm:$0xff]   ;;  %v4476_v12 = vld [vmem:[#allocation6 + $0x74] ss:$48 sps:$4 sm:$0xff]  }
  0xb6   : > { %2663 = vmatpush1.bf16.msra.mxu0 %v4382_v13  ;;  %2745 = vmatpush1.bf16.msra.mxu1 %v4385_v14  ;;  %v4479_v13 = vld [vmem:[#allocation6 + $0x7c] ss:$48 sps:$4 sm:$0xff]   ;;  %v4474_v14 = vld [vmem:[#allocation6 + $0x70] ss:$48 sps:$4 sm:$0xff]  }
  0xb7   : > { %2664 = vmatprep.subr.bf16.mxu0 %v4390_v15  ;;  %2746 = vmatprep.subr.bf16.mxu1 %v4393_v16  ;;  %v4477_v15 = vld [vmem:[#allocation6 + $0x78] ss:$48 sps:$4 sm:$0xff]   ;;  %v4482_v16 = vld [vmem:[#allocation6 + $0xd4] ss:$48 sps:$4 sm:$0xff]  }
  0xba   : > { %2665 = vmatpush1.bf16.msra.mxu0 %v4388_v17  ;;  %2747 = vmatpush1.bf16.msra.mxu1 %v4391_v18  ;;  %v4485_v17 = vld [vmem:[#allocation6 + $0xdc] ss:$48 sps:$4 sm:$0xff]   ;;  %v4480_v18 = vld [vmem:[#allocation6 + $0xd0] ss:$48 sps:$4 sm:$0xff]  }
  0xbb   : > { %2666 = vmatprep.subr.bf16.mxu0 %v4396_v19  ;;  %2748 = vmatprep.subr.bf16.mxu1 %v4399_v20  ;;  %v4483_v19 = vld [vmem:[#allocation6 + $0xd8] ss:$48 sps:$4 sm:$0xff]   ;;  %v4488_v20 = vld [vmem:[#allocation6 + $0x134] ss:$48 sps:$4 sm:$0xff]  }
  0xbe   : > { %2667 = vmatpush1.bf16.msra.mxu0 %v4394_v21  ;;  %2749 = vmatpush1.bf16.msra.mxu1 %v4397_v22  ;;  %v4491_v21 = vld [vmem:[#allocation6 + $0x13c] ss:$48 sps:$4 sm:$0xff]   ;;  %v4486_v22 = vld [vmem:[#allocation6 + $0x130] ss:$48 sps:$4 sm:$0xff]  }
  0xbf   : > { %2668 = vmatprep.subr.bf16.mxu0 %v4402_v23  ;;  %2750 = vmatprep.subr.bf16.mxu1 %v4405_v24  ;;  %v4489_v23 = vld [vmem:[#allocation6 + $0x138] ss:$48 sps:$4 sm:$0xff]   ;;  %v4494_v24 = vld [vmem:[#allocation6 + $0x194] ss:$48 sps:$4 sm:$0xff]  }
  0xc2   : > { %2669 = vmatpush1.bf16.msra.mxu0 %v4400_v25  ;;  %2751 = vmatpush1.bf16.msra.mxu1 %v4403_v26  ;;  %v4497_v25 = vld [vmem:[#allocation6 + $0x19c] ss:$48 sps:$4 sm:$0xff]   ;;  %v4492_v26 = vld [vmem:[#allocation6 + $0x190] ss:$48 sps:$4 sm:$0xff]  }
  0xc3   : > { %2670 = vmatprep.subr.bf16.mxu0 %v4408_v27  ;;  %2752 = vmatprep.subr.bf16.mxu1 %v4411_v28  ;;  %v4495_v27 = vld [vmem:[#allocation6 + $0x198] ss:$48 sps:$4 sm:$0xff]   ;;  %v4500_v28 = vld [vmem:[#allocation6 + $0x1f4] ss:$48 sps:$4 sm:$0xff]  }
  0xc6   : > { %2671 = vmatpush1.bf16.msra.mxu0 %v4406_v31  ;;  %2753 = vmatpush1.bf16.msra.mxu1 %v4409_v32  ;;  %v4498_v31 = vld [vmem:[#allocation6 + $0x1f0] ss:$48 sps:$4 sm:$0xff]   ;;  %v4501_v32 = vld [vmem:[#allocation6 + $0x1f8] ss:$48 sps:$4 sm:$0xff]  }
  0xc7   : > { %2672 = vmatprep.subr.bf16.mxu0 %v4414_v33  ;;  %2754 = vmatprep.subr.bf16.mxu1 %v4417_v34  ;;  %v4506_v33 = vld [vmem:[#allocation6 + $0x254] ss:$48 sps:$4 sm:$0xff]   ;;  %v4509_v34 = vld [vmem:[#allocation6 + $0x25c] ss:$48 sps:$4 sm:$0xff]  }
  0xca   : > { %2673 = vmatpush1.bf16.msra.mxu0 %v4412_v35  ;;  %2755 = vmatpush1.bf16.msra.mxu1 %v4415_v36  ;;  %v4504_v35 = vld [vmem:[#allocation6 + $0x250] ss:$48 sps:$4 sm:$0xff]   ;;  %v4507_v36 = vld [vmem:[#allocation6 + $0x258] ss:$48 sps:$4 sm:$0xff]  }
  0xcb   : > { %2674 = vmatprep.subr.bf16.mxu0 %v4420_v37  ;;  %2756 = vmatprep.subr.bf16.mxu1 %v4423_v38  ;;  %v4512_v37 = vld [vmem:[#allocation6 + $0x2b4] ss:$48 sps:$4 sm:$0xff]   ;;  %v4515_v38 = vld [vmem:[#allocation6 + $0x2bc] ss:$48 sps:$4 sm:$0xff]  }
  0xce   : > { %2675 = vmatpush1.bf16.msra.mxu0 %v4418_v39  ;;  %2757 = vmatpush1.bf16.msra.mxu1 %v4421_v40  ;;  %v4510_v39 = vld [vmem:[#allocation6 + $0x2b0] ss:$48 sps:$4 sm:$0xff]   ;;  %v4513_v40 = vld [vmem:[#allocation6 + $0x2b8] ss:$48 sps:$4 sm:$0xff]  }
  0xcf   : > { %2676 = vmatprep.subr.bf16.mxu0 %v4426_v41  ;;  %2758 = vmatprep.subr.bf16.mxu1 %v4429_v42  ;;  %v4518_v41 = vld [vmem:[#allocation6 + $0x314] ss:$48 sps:$4 sm:$0xff]   ;;  %v4521_v42 = vld [vmem:[#allocation6 + $0x31c] ss:$48 sps:$4 sm:$0xff]  }
  0xd2   : > { %2677 = vmatpush1.bf16.msra.mxu0 %v4424_v43  ;;  %2759 = vmatpush1.bf16.msra.mxu1 %v4427_v44  ;;  %v4516_v43 = vld [vmem:[#allocation6 + $0x310] ss:$48 sps:$4 sm:$0xff]   ;;  %v4519_v44 = vld [vmem:[#allocation6 + $0x318] ss:$48 sps:$4 sm:$0xff]  }
  0xd3   : > { %2678 = vmatprep.subr.bf16.mxu0 %v4432_v45  ;;  %2760 = vmatprep.subr.bf16.mxu1 %v4435_v46  ;;  %v4524_v45 = vld [vmem:[#allocation6 + $0x374] ss:$48 sps:$4 sm:$0xff]   ;;  %v4527_v46 = vld [vmem:[#allocation6 + $0x37c] ss:$48 sps:$4 sm:$0xff]  }
  0xd6   : > { %2679 = vmatpush1.bf16.msra.mxu0 %v4430_v47  ;;  %2761 = vmatpush1.bf16.msra.mxu1 %v4433_v49  ;;  %v4522_v47 = vld [vmem:[#allocation6 + $0x370] ss:$48 sps:$4 sm:$0xff]   ;;  %v4525_v49 = vld [vmem:[#allocation6 + $0x378] ss:$48 sps:$4 sm:$0xff]  }
  0xd7   : > { %2680 = vmatprep.subr.bf16.mxu0 %v4438_v50  ;;  %2762 = vmatprep.subr.bf16.mxu1 %v4441_v51  ;;  %v4530_v50 = vld [vmem:[#allocation6 + $0x3d4] ss:$48 sps:$4 sm:$0xff]   ;;  %v4533_v51 = vld [vmem:[#allocation6 + $0x3dc] ss:$48 sps:$4 sm:$0xff]  }
  0xda   : > { %2681 = vmatpush1.bf16.msra.mxu0 %v4436_v52  ;;  %2763 = vmatpush1.bf16.msra.mxu1 %v4439_v53  ;;  %v4528_v52 = vld [vmem:[#allocation6 + $0x3d0] ss:$48 sps:$4 sm:$0xff]   ;;  %v4531_v53 = vld [vmem:[#allocation6 + $0x3d8] ss:$48 sps:$4 sm:$0xff]  }
  0xdb   : > { %2682 = vmatprep.subr.bf16.mxu0 %v4444_v54  ;;  %2764 = vmatprep.subr.bf16.mxu1 %v4447_v55  ;;  %v4536_v54 = vld [vmem:[#allocation6 + $0x434] ss:$48 sps:$4 sm:$0xff]   ;;  %v4539_v55 = vld [vmem:[#allocation6 + $0x43c] ss:$48 sps:$4 sm:$0xff]  }
  0xde   : > { %2683 = vmatpush1.bf16.msra.mxu0 %v4442_v56  ;;  %2765 = vmatpush1.bf16.msra.mxu1 %v4445_v57  ;;  %v4534_v56 = vld [vmem:[#allocation6 + $0x430] ss:$48 sps:$4 sm:$0xff]   ;;  %v4537_v57 = vld [vmem:[#allocation6 + $0x438] ss:$48 sps:$4 sm:$0xff]  }
  0xdf   : > { %2684 = vmatprep.subr.bf16.mxu0 %v4450_v58  ;;  %2766 = vmatprep.subr.bf16.mxu1 %v4453_v59  ;;  %v4542_v58 = vld [vmem:[#allocation6 + $0x494] ss:$48 sps:$4 sm:$0xff]   ;;  %v4545_v59 = vld [vmem:[#allocation6 + $0x49c] ss:$48 sps:$4 sm:$0xff]  }
  0xe2   : > { %2685 = vmatpush1.bf16.msra.mxu0 %v4448_v60  ;;  %2767 = vmatpush1.bf16.msra.mxu1 %v4451_v61  ;;  %v4540_v60 = vld [vmem:[#allocation6 + $0x490] ss:$48 sps:$4 sm:$0xff]   ;;  %v4543_v61 = vld [vmem:[#allocation6 + $0x498] ss:$48 sps:$4 sm:$0xff]  }
  0xe3   : > { %2686 = vmatprep.subr.bf16.mxu0 %v4456_v62  ;;  %2768 = vmatprep.subr.bf16.mxu1 %v4459_v63  ;;  %v4548_v62 = vld [vmem:[#allocation6 + $0x4f4] ss:$48 sps:$4 sm:$0xff]   ;;  %v4551_v63 = vld [vmem:[#allocation6 + $0x4fc] ss:$48 sps:$4 sm:$0xff]  }
  0xe6   : > { %2687 = vmatpush1.bf16.msra.mxu0 %v4454_v0  ;;  %2769 = vmatpush1.bf16.msra.mxu1 %v4457_v1  ;;  %v4546_v0 = vld [vmem:[#allocation6 + $0x4f0] ss:$48 sps:$4 sm:$0xff]   ;;  %v4549_v1 = vld [vmem:[#allocation6 + $0x4f8] ss:$48 sps:$4 sm:$0xff]  }
  0xe7   : > { %2688 = vmatprep.subr.bf16.mxu0 %v4462_v2  ;;  %2770 = vmatprep.subr.bf16.mxu1 %v4465_v3  ;;  %v4554_v2 = vld [vmem:[#allocation6 + $0x554] ss:$48 sps:$4 sm:$0xff]   ;;  %v4557_v3 = vld [vmem:[#allocation6 + $0x55c] ss:$48 sps:$4 sm:$0xff]  }
  0xea   : > { %2689 = vmatpush1.bf16.msra.mxu0 %v4460_v4  ;;  %2771 = vmatpush1.bf16.msra.mxu1 %v4463_v6  ;;  %v4552_v4 = vld [vmem:[#allocation6 + $0x550] ss:$48 sps:$4 sm:$0xff]   ;;  %v4555_v6 = vld [vmem:[#allocation6 + $0x558] ss:$48 sps:$4 sm:$0xff]  }
  0xeb   : > { %2781 = vmatprep.subr.bf16.mxu0 %v4470_v7  ;;  %2863 = vmatprep.subr.bf16.mxu1 %v4473_v8  ;;  %v4560_v7 = vld [vmem:[#allocation6 + $0x5b4] ss:$48 sps:$4 sm:$0xff]   ;;  %v4563_v8 = vld [vmem:[#allocation6 + $0x5bc] ss:$48 sps:$4 sm:$0xff]  }
  0xed   : > { %2691 = vmatmul.mubr.bf16.vlgmr.msra.gmra.mrb[0].mxu0 %v5289_v9  ;;  %2773 = vmatmul.mubr.bf16.vlgmr.msra.gmra.mrb[0].mxu1 %v5289_v9 }
  0xee   : > { %2782 = vmatpush1.bf16.msra.mxu0 %v4468_v10  ;;  %2864 = vmatpush1.bf16.msra.mxu1 %v4471_v11  ;;  %v4558_v10 = vld [vmem:[#allocation6 + $0x5b0] ss:$48 sps:$4 sm:$0xff]   ;;  %v4561_v11 = vld [vmem:[#allocation6 + $0x5b8] ss:$48 sps:$4 sm:$0xff]  }
  0xef   : > { %2783 = vmatprep.subr.bf16.mxu0 %v4476_v12  ;;  %2865 = vmatprep.subr.bf16.mxu1 %v4479_v13  ;;  %v4566_v12 = vld [vmem:[#allocation6 + $0x614] ss:$48 sps:$4 sm:$0xff]   ;;  %v4569_v13 = vld [vmem:[#allocation6 + $0x61c] ss:$48 sps:$4 sm:$0xff]  }
  0xf0   : > { %2813 = vmatprep.mubr.bf16.mxu0 %v5270_v48  ;;  %2895 = vmatprep.mubr.bf16.mxu1 %v5270_v48 }
  0xf2   : > { %2784 = vmatpush1.bf16.msra.mxu0 %v4474_v14  ;;  %2866 = vmatpush1.bf16.msra.mxu1 %v4477_v15  ;;  %v4564_v14 = vld [vmem:[#allocation6 + $0x610] ss:$48 sps:$4 sm:$0xff]   ;;  %v4567_v15 = vld [vmem:[#allocation6 + $0x618] ss:$48 sps:$4 sm:$0xff]  }
  0xf3   : > { %2785 = vmatprep.subr.bf16.mxu0 %v4482_v16  ;;  %2867 = vmatprep.subr.bf16.mxu1 %v4485_v17  ;;  %v4572_v16 = vld [vmem:[#allocation6 + $0x674] ss:$48 sps:$4 sm:$0xff]   ;;  %v4575_v17 = vld [vmem:[#allocation6 + $0x67c] ss:$48 sps:$4 sm:$0xff]  }
  0xf6   : > { %2786 = vmatpush1.bf16.msra.mxu0 %v4480_v18  ;;  %2868 = vmatpush1.bf16.msra.mxu1 %v4483_v19  ;;  %v4570_v18 = vld [vmem:[#allocation6 + $0x670] ss:$48 sps:$4 sm:$0xff]   ;;  %v4573_v19 = vld [vmem:[#allocation6 + $0x678] ss:$48 sps:$4 sm:$0xff]  }
  0xf7   : > { %2787 = vmatprep.subr.bf16.mxu0 %v4488_v20  ;;  %2869 = vmatprep.subr.bf16.mxu1 %v4491_v21  ;;  %v4578_v20 = vld [vmem:[#allocation6 + $0x6d4] ss:$48 sps:$4 sm:$0xff]   ;;  %v4581_v21 = vld [vmem:[#allocation6 + $0x6dc] ss:$48 sps:$4 sm:$0xff]  }
  0xfa   : > { %2788 = vmatpush1.bf16.msra.mxu0 %v4486_v22  ;;  %2870 = vmatpush1.bf16.msra.mxu1 %v4489_v23  ;;  %v4576_v22 = vld [vmem:[#allocation6 + $0x6d0] ss:$48 sps:$4 sm:$0xff]   ;;  %v4579_v23 = vld [vmem:[#allocation6 + $0x6d8] ss:$48 sps:$4 sm:$0xff]  }
  0xfb   : > { %2789 = vmatprep.subr.bf16.mxu0 %v4494_v24  ;;  %2871 = vmatprep.subr.bf16.mxu1 %v4497_v25  ;;  %v4584_v24 = vld [vmem:[#allocation6 + $0x734] ss:$48 sps:$4 sm:$0xff]   ;;  %v4587_v25 = vld [vmem:[#allocation6 + $0x73c] ss:$48 sps:$4 sm:$0xff]  }
  0xfe   : > { %2790 = vmatpush1.bf16.msra.mxu0 %v4492_v26  ;;  %2872 = vmatpush1.bf16.msra.mxu1 %v4495_v27  ;;  %v4582_v26 = vld [vmem:[#allocation6 + $0x730] ss:$48 sps:$4 sm:$0xff]   ;;  %v4585_v27 = vld [vmem:[#allocation6 + $0x738] ss:$48 sps:$4 sm:$0xff]  }
  0xff   : > { %2791 = vmatprep.subr.bf16.mxu0 %v4500_v28  ;;  %2873 = vmatprep.subr.bf16.mxu1 %v4503_v29  ;;  %v4590_v28 = vld [vmem:[#allocation6 + $0x794] ss:$48 sps:$4 sm:$0xff]   ;;  %v4593_v29 = vld [vmem:[#allocation6 + $0x79c] ss:$48 sps:$4 sm:$0xff]  }
 0x102   : > { %2792 = vmatpush1.bf16.msra.mxu0 %v4498_v31  ;;  %2874 = vmatpush1.bf16.msra.mxu1 %v4501_v32  ;;  %v4588_v31 = vld [vmem:[#allocation6 + $0x790] ss:$48 sps:$4 sm:$0xff]   ;;  %v4591_v32 = vld [vmem:[#allocation6 + $0x798] ss:$48 sps:$4 sm:$0xff]  }
 0x103   : > { %2793 = vmatprep.subr.bf16.mxu0 %v4506_v33  ;;  %2875 = vmatprep.subr.bf16.mxu1 %v4509_v34  ;;  %v4596_v33 = vld [vmem:[#allocation6 + $0x7f4] ss:$48 sps:$4 sm:$0xff]   ;;  %v4599_v34 = vld [vmem:[#allocation6 + $0x7fc] ss:$48 sps:$4 sm:$0xff]  }
 0x106   : > { %2794 = vmatpush1.bf16.msra.mxu0 %v4504_v35  ;;  %2876 = vmatpush1.bf16.msra.mxu1 %v4507_v36  ;;  %v4594_v35 = vld [vmem:[#allocation6 + $0x7f0] ss:$48 sps:$4 sm:$0xff]   ;;  %v4597_v36 = vld [vmem:[#allocation6 + $0x7f8] ss:$48 sps:$4 sm:$0xff]  }
 0x107   : > { %2795 = vmatprep.subr.bf16.mxu0 %v4512_v37  ;;  %2877 = vmatprep.subr.bf16.mxu1 %v4515_v38  ;;  %v4602_v37 = vld [vmem:[#allocation6 + $0x854] ss:$48 sps:$4 sm:$0xff]   ;;  %v4605_v38 = vld [vmem:[#allocation6 + $0x85c] ss:$48 sps:$4 sm:$0xff]  }
 0x10a   : > { %2796 = vmatpush1.bf16.msra.mxu0 %v4510_v39  ;;  %2878 = vmatpush1.bf16.msra.mxu1 %v4513_v40  ;;  %v4600_v39 = vld [vmem:[#allocation6 + $0x850] ss:$48 sps:$4 sm:$0xff]   ;;  %v4603_v40 = vld [vmem:[#allocation6 + $0x858] ss:$48 sps:$4 sm:$0xff]  }
 0x10b   : > { %2797 = vmatprep.subr.bf16.mxu0 %v4518_v41  ;;  %2879 = vmatprep.subr.bf16.mxu1 %v4521_v42  ;;  %v4608_v41 = vld [vmem:[#allocation6 + $0x8b4] ss:$48 sps:$4 sm:$0xff]   ;;  %v4611_v42 = vld [vmem:[#allocation6 + $0x8bc] ss:$48 sps:$4 sm:$0xff]  }
 0x10e   : > { %2798 = vmatpush1.bf16.msra.mxu0 %v4516_v43  ;;  %2880 = vmatpush1.bf16.msra.mxu1 %v4519_v44  ;;  %v4606_v43 = vld [vmem:[#allocation6 + $0x8b0] ss:$48 sps:$4 sm:$0xff]   ;;  %v4609_v44 = vld [vmem:[#allocation6 + $0x8b8] ss:$48 sps:$4 sm:$0xff]  }
 0x10f   : > { %2799 = vmatprep.subr.bf16.mxu0 %v4524_v45  ;;  %2881 = vmatprep.subr.bf16.mxu1 %v4527_v46  ;;  %v4614_v45 = vld [vmem:[#allocation6 + $0x914] ss:$48 sps:$4 sm:$0xff]   ;;  %v4617_v46 = vld [vmem:[#allocation6 + $0x91c] ss:$48 sps:$4 sm:$0xff]  }
 0x112   : > { %2800 = vmatpush1.bf16.msra.mxu0 %v4522_v47  ;;  %2882 = vmatpush1.bf16.msra.mxu1 %v4525_v49  ;;  %v4612_v47 = vld [vmem:[#allocation6 + $0x910] ss:$48 sps:$4 sm:$0xff]   ;;  %v4615_v49 = vld [vmem:[#allocation6 + $0x918] ss:$48 sps:$4 sm:$0xff]  }
 0x113   : > { %2801 = vmatprep.subr.bf16.mxu0 %v4530_v50  ;;  %2883 = vmatprep.subr.bf16.mxu1 %v4533_v51  ;;  %v4620_v50 = vld [vmem:[#allocation6 + $0x974] ss:$48 sps:$4 sm:$0xff]   ;;  %v4623_v51 = vld [vmem:[#allocation6 + $0x97c] ss:$48 sps:$4 sm:$0xff]  }
 0x116   : > { %2802 = vmatpush1.bf16.msra.mxu0 %v4528_v52  ;;  %2884 = vmatpush1.bf16.msra.mxu1 %v4531_v53  ;;  %v4618_v52 = vld [vmem:[#allocation6 + $0x970] ss:$48 sps:$4 sm:$0xff]   ;;  %v4621_v53 = vld [vmem:[#allocation6 + $0x978] ss:$48 sps:$4 sm:$0xff]  }
 0x117   : > { %2803 = vmatprep.subr.bf16.mxu0 %v4536_v54  ;;  %2885 = vmatprep.subr.bf16.mxu1 %v4539_v55  ;;  %v4626_v54 = vld [vmem:[#allocation6 + $0x9d4] ss:$48 sps:$4 sm:$0xff]   ;;  %v4629_v55 = vld [vmem:[#allocation6 + $0x9dc] ss:$48 sps:$4 sm:$0xff]  }
 0x11a   : > { %2804 = vmatpush1.bf16.msra.mxu0 %v4534_v56  ;;  %2886 = vmatpush1.bf16.msra.mxu1 %v4537_v57  ;;  %v4624_v56 = vld [vmem:[#allocation6 + $0x9d0] ss:$48 sps:$4 sm:$0xff]   ;;  %v4627_v57 = vld [vmem:[#allocation6 + $0x9d8] ss:$48 sps:$4 sm:$0xff]  }
 0x11b   : > { %2805 = vmatprep.subr.bf16.mxu0 %v4542_v58  ;;  %2887 = vmatprep.subr.bf16.mxu1 %v4545_v59  ;;  %v4632_v58 = vld [vmem:[#allocation6 + $0xa34] ss:$48 sps:$4 sm:$0xff]   ;;  %v4635_v59 = vld [vmem:[#allocation6 + $0xa3c] ss:$48 sps:$4 sm:$0xff]  }
 0x11e   : > { %2806 = vmatpush1.bf16.msra.mxu0 %v4540_v60  ;;  %2888 = vmatpush1.bf16.msra.mxu1 %v4543_v61  ;;  %v4630_v60 = vld [vmem:[#allocation6 + $0xa30] ss:$48 sps:$4 sm:$0xff]   ;;  %v4633_v61 = vld [vmem:[#allocation6 + $0xa38] ss:$48 sps:$4 sm:$0xff]  }
 0x11f   : > { %2807 = vmatprep.subr.bf16.mxu0 %v4548_v62  ;;  %2889 = vmatprep.subr.bf16.mxu1 %v4551_v63  ;;  %v4638_v62 = vld [vmem:[#allocation6 + $0xa94] ss:$48 sps:$4 sm:$0xff]   ;;  %v4641_v63 = vld [vmem:[#allocation6 + $0xa9c] ss:$48 sps:$4 sm:$0xff]  }
 0x122   : > { %2808 = vmatpush1.bf16.msra.mxu0 %v4546_v0  ;;  %2890 = vmatpush1.bf16.msra.mxu1 %v4549_v1  ;;  %v4636_v0 = vld [vmem:[#allocation6 + $0xa90] ss:$48 sps:$4 sm:$0xff]   ;;  %v4639_v1 = vld [vmem:[#allocation6 + $0xa98] ss:$48 sps:$4 sm:$0xff]  }
 0x123   : > { %2809 = vmatprep.subr.bf16.mxu0 %v4554_v2  ;;  %2891 = vmatprep.subr.bf16.mxu1 %v4557_v3  ;;  %v4644_v2 = vld [vmem:[#allocation6 + $0xaf4] ss:$48 sps:$4 sm:$0xff]   ;;  %v4647_v3 = vld [vmem:[#allocation6 + $0xafc] ss:$48 sps:$4 sm:$0xff]  }
 0x126   : > { %2810 = vmatpush1.bf16.msra.mxu0 %v4552_v4  ;;  %2892 = vmatpush1.bf16.msra.mxu1 %v4555_v6  ;;  %v4642_v4 = vld [vmem:[#allocation6 + $0xaf0] ss:$48 sps:$4 sm:$0xff]   ;;  %v4645_v6 = vld [vmem:[#allocation6 + $0xaf8] ss:$48 sps:$4 sm:$0xff]  }
 0x127   : > { %2811 = vmatprep.subr.bf16.mxu0 %v4560_v7  ;;  %2893 = vmatprep.subr.bf16.mxu1 %v4563_v8  ;;  %v4650_v7 = vld [vmem:[#allocation6 + $0xb54] ss:$48 sps:$4 sm:$0xff]   ;;  %v4653_v8 = vld [vmem:[#allocation6 + $0xb5c] ss:$48 sps:$4 sm:$0xff]  }
 0x12a   : > { %2812 = vmatpush1.bf16.msra.mxu0 %v4558_v10  ;;  %2894 = vmatpush1.bf16.msra.mxu1 %v4561_v11  ;;  %v4648_v10 = vld [vmem:[#allocation6 + $0xb50] ss:$48 sps:$4 sm:$0xff]   ;;  %v4651_v11 = vld [vmem:[#allocation6 + $0xb58] ss:$48 sps:$4 sm:$0xff]  }
 0x12b   : > { %2822 = vmatprep.subr.bf16.mxu0 %v4566_v12  ;;  %2904 = vmatprep.subr.bf16.mxu1 %v4569_v13  ;;  %v4656_v12 = vld [vmem:[#allocation6 + $0xbb4] ss:$48 sps:$4 sm:$0xff]   ;;  %v4659_v13 = vld [vmem:[#allocation6 + $0xbbc] ss:$48 sps:$4 sm:$0xff]  }
 0x12d   : > { %2814 = vmatmul.mubr.bf16.vlgmr.msra.gmra.mrb[4].mxu0 %v5274_v5  ;;  %2896 = vmatmul.mubr.bf16.vlgmr.msra.gmra.mrb[4].mxu1 %v5274_v5 }
 0x12e   : > { %2823 = vmatpush1.bf16.msra.mxu0 %v4564_v14  ;;  %2905 = vmatpush1.bf16.msra.mxu1 %v4567_v15  ;;  %v4654_v14 = vld [vmem:[#allocation6 + $0xbb0] ss:$48 sps:$4 sm:$0xff]   ;;  %v4657_v15 = vld [vmem:[#allocation6 + $0xbb8] ss:$48 sps:$4 sm:$0xff]  }
 0x12f   : > { %2824 = vmatprep.subr.bf16.mxu0 %v4572_v16  ;;  %2906 = vmatprep.subr.bf16.mxu1 %v4575_v17  ;;  %v4662_v16 = vld [vmem:[#allocation6 + $0x24] ss:$48 sps:$4 sm:$0xff]   ;;  %v4660_v17 = vld [vmem:[#allocation6 + $0x20] ss:$48 sps:$4 sm:$0xff]  }
 0x130   : > { %2854 = vmatprep.mubr.bf16.mxu0 %v5283_v30  ;;  %2936 = vmatprep.mubr.bf16.mxu1 %v5283_v30 }
 0x132   : > { %2825 = vmatpush1.bf16.msra.mxu0 %v4570_v18  ;;  %2907 = vmatpush1.bf16.msra.mxu1 %v4573_v19  ;;  %v4665_v18 = vld [vmem:[#allocation6 + $0x84] ss:$48 sps:$4 sm:$0xff]   ;;  %v4663_v19 = vld [vmem:[#allocation6 + $0x80] ss:$48 sps:$4 sm:$0xff]  }
 0x133   : > { %2826 = vmatprep.subr.bf16.mxu0 %v4578_v20  ;;  %2908 = vmatprep.subr.bf16.mxu1 %v4581_v21  ;;  %v4668_v20 = vld [vmem:[#allocation6 + $0xe4] ss:$48 sps:$4 sm:$0xff]   ;;  %v4666_v21 = vld [vmem:[#allocation6 + $0xe0] ss:$48 sps:$4 sm:$0xff]  }
 0x136   : > { %2827 = vmatpush1.bf16.msra.mxu0 %v4576_v22  ;;  %2909 = vmatpush1.bf16.msra.mxu1 %v4579_v23  ;;  %v4671_v22 = vld [vmem:[#allocation6 + $0x144] ss:$48 sps:$4 sm:$0xff]   ;;  %v4669_v23 = vld [vmem:[#allocation6 + $0x140] ss:$48 sps:$4 sm:$0xff]  }
 0x137   : > { %2828 = vmatprep.subr.bf16.mxu0 %v4584_v24  ;;  %2910 = vmatprep.subr.bf16.mxu1 %v4587_v25  ;;  %v4674_v24 = vld [vmem:[#allocation6 + $0x1a4] ss:$48 sps:$4 sm:$0xff]   ;;  %v4672_v25 = vld [vmem:[#allocation6 + $0x1a0] ss:$48 sps:$4 sm:$0xff]  }
 0x13a   : > { %2829 = vmatpush1.bf16.msra.mxu0 %v4582_v26  ;;  %2911 = vmatpush1.bf16.msra.mxu1 %v4585_v27  ;;  %v4677_v26 = vld [vmem:[#allocation6 + $0x204] ss:$48 sps:$4 sm:$0xff]   ;;  %v4675_v27 = vld [vmem:[#allocation6 + $0x200] ss:$48 sps:$4 sm:$0xff]  }
 0x13b   : > { %2830 = vmatprep.subr.bf16.mxu0 %v4590_v28  ;;  %2912 = vmatprep.subr.bf16.mxu1 %v4593_v29  ;;  %v4680_v28 = vld [vmem:[#allocation6 + $0x264] ss:$48 sps:$4 sm:$0xff]   ;;  %v4678_v29 = vld [vmem:[#allocation6 + $0x260] ss:$48 sps:$4 sm:$0xff]  }
 0x13e   : > { %2831 = vmatpush1.bf16.msra.mxu0 %v4588_v31  ;;  %2913 = vmatpush1.bf16.msra.mxu1 %v4591_v32  ;;  %v4681_v31 = vld [vmem:[#allocation6 + $0x2c0] ss:$48 sps:$4 sm:$0xff]   ;;  %v4686_v32 = vld [vmem:[#allocation6 + $0x324] ss:$48 sps:$4 sm:$0xff]  }
 0x13f   : > { %2832 = vmatprep.subr.bf16.mxu0 %v4596_v33  ;;  %2914 = vmatprep.subr.bf16.mxu1 %v4599_v34  ;;  %v4684_v33 = vld [vmem:[#allocation6 + $0x320] ss:$48 sps:$4 sm:$0xff]   ;;  %v4689_v34 = vld [vmem:[#allocation6 + $0x384] ss:$48 sps:$4 sm:$0xff]  }
 0x142   : > { %2833 = vmatpush1.bf16.msra.mxu0 %v4594_v35  ;;  %2915 = vmatpush1.bf16.msra.mxu1 %v4597_v36  ;;  %v4687_v35 = vld [vmem:[#allocation6 + $0x380] ss:$48 sps:$4 sm:$0xff]   ;;  %v4692_v36 = vld [vmem:[#allocation6 + $0x3e4] ss:$48 sps:$4 sm:$0xff]  }
 0x143   : > { %2834 = vmatprep.subr.bf16.mxu0 %v4602_v37  ;;  %2916 = vmatprep.subr.bf16.mxu1 %v4605_v38  ;;  %v4690_v37 = vld [vmem:[#allocation6 + $0x3e0] ss:$48 sps:$4 sm:$0xff]   ;;  %v4695_v38 = vld [vmem:[#allocation6 + $0x444] ss:$48 sps:$4 sm:$0xff]  }
 0x146   : > { %2835 = vmatpush1.bf16.msra.mxu0 %v4600_v39  ;;  %2917 = vmatpush1.bf16.msra.mxu1 %v4603_v40  ;;  %v4693_v39 = vld [vmem:[#allocation6 + $0x440] ss:$48 sps:$4 sm:$0xff]   ;;  %v4698_v40 = vld [vmem:[#allocation6 + $0x4a4] ss:$48 sps:$4 sm:$0xff]  }
 0x147   : > { %2836 = vmatprep.subr.bf16.mxu0 %v4608_v41  ;;  %2918 = vmatprep.subr.bf16.mxu1 %v4611_v42  ;;  %v4696_v41 = vld [vmem:[#allocation6 + $0x4a0] ss:$48 sps:$4 sm:$0xff]   ;;  %v4701_v42 = vld [vmem:[#allocation6 + $0x504] ss:$48 sps:$4 sm:$0xff]  }
 0x14a   : > { %2837 = vmatpush1.bf16.msra.mxu0 %v4606_v43  ;;  %2919 = vmatpush1.bf16.msra.mxu1 %v4609_v44  ;;  %v4699_v43 = vld [vmem:[#allocation6 + $0x500] ss:$48 sps:$4 sm:$0xff]   ;;  %v4704_v44 = vld [vmem:[#allocation6 + $0x564] ss:$48 sps:$4 sm:$0xff]  }
 0x14b   : > { %2838 = vmatprep.subr.bf16.mxu0 %v4614_v45  ;;  %2920 = vmatprep.subr.bf16.mxu1 %v4617_v46  ;;  %v4702_v45 = vld [vmem:[#allocation6 + $0x560] ss:$48 sps:$4 sm:$0xff]   ;;  %v4707_v46 = vld [vmem:[#allocation6 + $0x5c4] ss:$48 sps:$4 sm:$0xff]  }
 0x14e   : > { %2839 = vmatpush1.bf16.msra.mxu0 %v4612_v47  ;;  %2921 = vmatpush1.bf16.msra.mxu1 %v4615_v49  ;;  %v4705_v47 = vld [vmem:[#allocation6 + $0x5c0] ss:$48 sps:$4 sm:$0xff]   ;;  %v4710_v49 = vld [vmem:[#allocation6 + $0x624] ss:$48 sps:$4 sm:$0xff]  }
 0x14f   : > { %2840 = vmatprep.subr.bf16.mxu0 %v4620_v50  ;;  %2922 = vmatprep.subr.bf16.mxu1 %v4623_v51  ;;  %v4708_v50 = vld [vmem:[#allocation6 + $0x620] ss:$48 sps:$4 sm:$0xff]   ;;  %v4713_v51 = vld [vmem:[#allocation6 + $0x684] ss:$48 sps:$4 sm:$0xff]  }
 0x152   : > { %2841 = vmatpush1.bf16.msra.mxu0 %v4618_v52  ;;  %2923 = vmatpush1.bf16.msra.mxu1 %v4621_v53  ;;  %v4711_v52 = vld [vmem:[#allocation6 + $0x680] ss:$48 sps:$4 sm:$0xff]   ;;  %v4716_v53 = vld [vmem:[#allocation6 + $0x6e4] ss:$48 sps:$4 sm:$0xff]  }
 0x153   : > { %2842 = vmatprep.subr.bf16.mxu0 %v4626_v54  ;;  %2924 = vmatprep.subr.bf16.mxu1 %v4629_v55  ;;  %v4714_v54 = vld [vmem:[#allocation6 + $0x6e0] ss:$48 sps:$4 sm:$0xff]   ;;  %v4719_v55 = vld [vmem:[#allocation6 + $0x744] ss:$48 sps:$4 sm:$0xff]  }
 0x156   : > { %2843 = vmatpush1.bf16.msra.mxu0 %v4624_v56  ;;  %2925 = vmatpush1.bf16.msra.mxu1 %v4627_v57  ;;  %v4717_v56 = vld [vmem:[#allocation6 + $0x740] ss:$48 sps:$4 sm:$0xff]   ;;  %v4722_v57 = vld [vmem:[#allocation6 + $0x7a4] ss:$48 sps:$4 sm:$0xff]  }
 0x157   : > { %2844 = vmatprep.subr.bf16.mxu0 %v4632_v58  ;;  %2926 = vmatprep.subr.bf16.mxu1 %v4635_v59  ;;  %v4720_v58 = vld [vmem:[#allocation6 + $0x7a0] ss:$48 sps:$4 sm:$0xff]   ;;  %v4725_v59 = vld [vmem:[#allocation6 + $0x804] ss:$48 sps:$4 sm:$0xff]  }
 0x15a   : > { %2845 = vmatpush1.bf16.msra.mxu0 %v4630_v60  ;;  %2927 = vmatpush1.bf16.msra.mxu1 %v4633_v61  ;;  %v4723_v60 = vld [vmem:[#allocation6 + $0x800] ss:$48 sps:$4 sm:$0xff]   ;;  %v4728_v61 = vld [vmem:[#allocation6 + $0x864] ss:$48 sps:$4 sm:$0xff]  }
 0x15b   : > { %2846 = vmatprep.subr.bf16.mxu0 %v4638_v62  ;;  %2928 = vmatprep.subr.bf16.mxu1 %v4641_v63 }
 0x15e   : > { %2847 = vmatpush1.bf16.msra.mxu0 %v4636_v0  ;;  %2929 = vmatpush1.bf16.msra.mxu1 %v4639_v1 }
 0x15f   : > { %2848 = vmatprep.subr.bf16.mxu0 %v4644_v2  ;;  %2930 = vmatprep.subr.bf16.mxu1 %v4647_v3 }
 0x162   : > { %2849 = vmatpush1.bf16.msra.mxu0 %v4642_v4  ;;  %2931 = vmatpush1.bf16.msra.mxu1 %v4645_v6  ;;  %v4726_v4 = vld [vmem:[#allocation6 + $0x860] ss:$48 sps:$4 sm:$0xff]  }
 0x163   : > { %2850 = vmatprep.subr.bf16.mxu0 %v4650_v7  ;;  %2932 = vmatprep.subr.bf16.mxu1 %v4653_v8  ;;  %v4731_v8 = vld [vmem:[#allocation6 + $0x8c4] ss:$48 sps:$4 sm:$0xff]  }
 0x166   : > { %2851 = vmatpush1.bf16.msra.mxu0 %v4648_v10  ;;  %2933 = vmatpush1.bf16.msra.mxu1 %v4651_v11  ;;  %v4729_v10 = vld [vmem:[#allocation6 + $0x8c0] ss:$48 sps:$4 sm:$0xff]   ;;  %v4734_v11 = vld [vmem:[#allocation6 + $0x924] ss:$48 sps:$4 sm:$0xff]  }
 0x167   : > { %2852 = vmatprep.subr.bf16.mxu0 %v4656_v12  ;;  %2934 = vmatprep.subr.bf16.mxu1 %v4659_v13  ;;  %v4732_v12 = vld [vmem:[#allocation6 + $0x920] ss:$48 sps:$4 sm:$0xff]   ;;  %v4737_v13 = vld [vmem:[#allocation6 + $0x984] ss:$48 sps:$4 sm:$0xff]  }
 0x16a   : > { %2853 = vmatpush1.bf16.msra.mxu0 %v4654_v14  ;;  %2935 = vmatpush1.bf16.msra.mxu1 %v4657_v15  ;;  %v4735_v14 = vld [vmem:[#allocation6 + $0x980] ss:$48 sps:$4 sm:$0xff]   ;;  %v4740_v15 = vld [vmem:[#allocation6 + $0x9e4] ss:$48 sps:$4 sm:$0xff]  }
 0x16b   : > { %2945 = vmatprep.subr.bf16.mxu0 %v4662_v16  ;;  %v4738_v16 = vld [vmem:[#allocation6 + $0x9e0] ss:$48 sps:$4 sm:$0xff]  }
 0x16d   : > { %2855 = vmatmul.mubr.bf16.vlgmr.msra.gmra.mrb[4].mxu0 %v5289_v9  ;;  %2937 = vmatmul.mubr.bf16.vlgmr.msra.gmra.mrb[4].mxu1 %v5289_v9 }
 0x16e   : > { %2946 = vmatpush1.bf16.msra.mxu0 %v4660_v17  ;;  %2977 = vmatprep.mubr.bf16.mxu0 %v5270_v48  ;;  %v4743_v17 = vld [vmem:[#allocation6 + $0xa44] ss:$48 sps:$4 sm:$0xff]  }
 0x16f   : > { %2947 = vmatprep.subr.bf16.mxu0 %v4665_v18  ;;  %3059 = vmatprep.mubr.bf16.mxu1 %v5270_v48  ;;  %v4683_v48 = vld [vmem:[#allocation6 + $0x2c4] ss:$48 sps:$4 sm:$0xff]   ;;  %v4756_v18 = vld [vmem:[#allocation6 + $0x28] ss:$48 sps:$4 sm:$0xff]  }
 0x172   : > { %2948 = vmatpush1.bf16.msra.mxu0 %v4663_v19  ;;  %v4758_v19 = vld [vmem:[#allocation6 + $0x2c] ss:$48 sps:$4 sm:$0xff]  }
 0x173   : > { %2949 = vmatprep.subr.bf16.mxu0 %v4668_v20  ;;  %v4741_v20 = vld [vmem:[#allocation6 + $0xa40] ss:$48 sps:$4 sm:$0xff]   ;;  %3027 = vmatprep.subr.bf16.mxu1 %v4758_v19  ;;  %v4828_v19 = vld [vmem:[#allocation6 + $0x928] ss:$48 sps:$4 sm:$0xff]  }
 0x174   : > { %3028 = vmatpush1.bf16.msra.mxu1 %v4756_v18  ;;  %v623_v18 = vlaneseq }
 0x176   : > { %2950 = vmatpush1.bf16.msra.mxu0 %v4666_v21  ;;  %v4761_v21 = vld [vmem:[#allocation6 + $0x8c] ss:$48 sps:$4 sm:$0xff]  }
 0x177   : > { %2951 = vmatprep.subr.bf16.mxu0 %v4671_v22  ;;  %v4746_v22 = vld [vmem:[#allocation6 + $0xaa4] ss:$48 sps:$4 sm:$0xff]   ;;  %3029 = vmatprep.subr.bf16.mxu1 %v4761_v21  ;;  %v5319_v21 = vshrl.u32 %v623_v18, 7 }
 0x17a   : > { %2952 = vmatpush1.bf16.msra.mxu0 %v4669_v23  ;;  %v4759_v23 = vld [vmem:[#allocation6 + $0x88] ss:$48 sps:$4 sm:$0xff]  }
 0x17b   : > { %2953 = vmatprep.subr.bf16.mxu0 %v4674_v24  ;;  %v4744_v24 = vld [vmem:[#allocation6 + $0xaa0] ss:$48 sps:$4 sm:$0xff]   ;;  %3030 = vmatpush1.bf16.msra.mxu1 %v4759_v23  ;;  %v641_v23 = vsub.s32 4, %v5319_v21 }
 0x17e   : > { %2954 = vmatpush1.bf16.msra.mxu0 %v4672_v25  ;;  %v4749_v25 = vld [vmem:[#allocation6 + $0xb04] ss:$48 sps:$4 sm:$0xff]  }
 0x17f   : > { %2955 = vmatprep.subr.bf16.mxu0 %v4677_v26  ;;  %v4762_v26 = vld [vmem:[#allocation6 + $0xe8] ss:$48 sps:$4 sm:$0xff]  }
 0x182   : > { %2956 = vmatpush1.bf16.msra.mxu0 %v4675_v27  ;;  %v4764_v27 = vld [vmem:[#allocation6 + $0xec] ss:$48 sps:$4 sm:$0xff]  }
 0x183   : > { %2957 = vmatprep.subr.bf16.mxu0 %v4680_v28  ;;  %v4747_v28 = vld [vmem:[#allocation6 + $0xb00] ss:$48 sps:$4 sm:$0xff]   ;;  %3031 = vmatprep.subr.bf16.mxu1 %v4764_v27  ;;  %v4834_v27 = vld [vmem:[#allocation6 + $0x9e8] ss:$48 sps:$4 sm:$0xff]  }
 0x184   : > { %3032 = vmatpush1.bf16.msra.mxu1 %v4762_v26  ;;  %v5323_v26 = vld [vmem:[#allocation8] sm:$0xff] }
 0x186   : > { %2958 = vmatpush1.bf16.msra.mxu0 %v4678_v29  ;;  %v4767_v29 = vld [vmem:[#allocation6 + $0x14c] ss:$48 sps:$4 sm:$0xff]  }
 0x187   : > { %2959 = vmatprep.subr.bf16.mxu0 %v4683_v48  ;;  %v4752_v48 = vld [vmem:[#allocation6 + $0xb64] ss:$48 sps:$4 sm:$0xff]   ;;  %3033 = vmatprep.subr.bf16.mxu1 %v4767_v29  ;;  %v4839_v29 = vld [vmem:[#allocation6 + $0xa4c] ss:$48 sps:$4 sm:$0xff]  }
 0x18a   : > { %2960 = vmatpush1.bf16.msra.mxu0 %v4681_v31  ;;  %v4765_v31 = vld [vmem:[#allocation6 + $0x148] ss:$48 sps:$4 sm:$0xff]  }
 0x18b   : > { %2961 = vmatprep.subr.bf16.mxu0 %v4686_v32  ;;  %v4750_v32 = vld [vmem:[#allocation6 + $0xb60] ss:$48 sps:$4 sm:$0xff]   ;;  %3034 = vmatpush1.bf16.msra.mxu1 %v4765_v31  ;;  %v645_v31 = vsub.s32 5, %v5319_v21 }
 0x18e   : > { %2962 = vmatpush1.bf16.msra.mxu0 %v4684_v33  ;;  %v4755_v33 = vld [vmem:[#allocation6 + $0xbc4] ss:$48 sps:$4 sm:$0xff]  }
 0x18f   : > { %2963 = vmatprep.subr.bf16.mxu0 %v4689_v34  ;;  %v4768_v34 = vld [vmem:[#allocation6 + $0x1a8] ss:$48 sps:$4 sm:$0xff]  }
 0x192   : > { %2964 = vmatpush1.bf16.msra.mxu0 %v4687_v35  ;;  %v4770_v35 = vld [vmem:[#allocation6 + $0x1ac] ss:$48 sps:$4 sm:$0xff]  }
 0x193   : > { %2965 = vmatprep.subr.bf16.mxu0 %v4692_v36  ;;  %v4773_v36 = vld [vmem:[#allocation6 + $0x20c] ss:$48 sps:$4 sm:$0xff]   ;;  %3035 = vmatprep.subr.bf16.mxu1 %v4770_v35 }
 0x194   : > { %3036 = vmatpush1.bf16.msra.mxu1 %v4768_v34  ;;  %v4837_v34 = vld [vmem:[#allocation6 + $0xa48] ss:$48 sps:$4 sm:$0xff]  }
 0x195   : > { %3037 = vmatprep.subr.bf16.mxu1 %v4773_v36 }
 0x196   : > { %2966 = vmatpush1.bf16.msra.mxu0 %v4690_v37  ;;  %v4753_v37 = vld [vmem:[#allocation6 + $0xbc0] ss:$48 sps:$4 sm:$0xff]  }
 0x197   : > { %2967 = vmatprep.subr.bf16.mxu0 %v4695_v38  ;;  %v4771_v38 = vld [vmem:[#allocation6 + $0x208] ss:$48 sps:$4 sm:$0xff]  }
 0x198   : > { %3038 = vmatpush1.bf16.msra.mxu1 %v4771_v38  ;;  %v4842_v38 = vld [vmem:[#allocation6 + $0xaac] ss:$48 sps:$4 sm:$0xff]  }
 0x19a   : > { %2968 = vmatpush1.bf16.msra.mxu0 %v4693_v39  ;;  %v4776_v39 = vld [vmem:[#allocation6 + $0x26c] ss:$48 sps:$4 sm:$0xff]  }
 0x19b   : > { %2969 = vmatprep.subr.bf16.mxu0 %v4698_v40  ;;  %v5047_v40 = vmov 0.0   ;;  %3039 = vmatprep.subr.bf16.mxu1 %v4776_v39 }
 0x19e   : > { %2970 = vmatpush1.bf16.msra.mxu0 %v4696_v41  ;;  %v4774_v41 = vld [vmem:[#allocation6 + $0x268] ss:$48 sps:$4 sm:$0xff]  }
 0x19f   : > { %2971 = vmatprep.subr.bf16.mxu0 %v4701_v42  ;;  %v4779_v42 = vld [vmem:[#allocation6 + $0x2cc] ss:$48 sps:$4 sm:$0xff]   ;;  %3040 = vmatpush1.bf16.msra.mxu1 %v4774_v41  ;;  %v629_v41 = vsub.s32 1, %v5319_v21 }
 0x1a0   : > { %3041 = vmatprep.subr.bf16.mxu1 %v4779_v42 }
 0x1a2   : > { %2972 = vmatpush1.bf16.msra.mxu0 %v4699_v43  ;;  %v4777_v43 = vld [vmem:[#allocation6 + $0x2c8] ss:$48 sps:$4 sm:$0xff]  }
 0x1a3   : > { %2973 = vmatprep.subr.bf16.mxu0 %v4704_v44  ;;  %v4782_v44 = vld [vmem:[#allocation6 + $0x32c] ss:$48 sps:$4 sm:$0xff]   ;;  %3042 = vmatpush1.bf16.msra.mxu1 %v4777_v43 }
 0x1a4   : > { %3043 = vmatprep.subr.bf16.mxu1 %v4782_v44 }
 0x1a6   : > { %2974 = vmatpush1.bf16.msra.mxu0 %v4702_v45  ;;  %v4780_v45 = vld [vmem:[#allocation6 + $0x328] ss:$48 sps:$4 sm:$0xff]  }
 0x1a7   : > { %2975 = vmatprep.subr.bf16.mxu0 %v4707_v46  ;;  %v4785_v46 = vld [vmem:[#allocation6 + $0x38c] ss:$48 sps:$4 sm:$0xff]   ;;  %3044 = vmatpush1.bf16.msra.mxu1 %v4780_v45  ;;  %v646_v45 = vrot.slane %v5323_v26, %v645_v31 }
 0x1a8   : > { %3045 = vmatprep.subr.bf16.mxu1 %v4785_v46 }
 0x1aa   : > { %2976 = vmatpush1.bf16.msra.mxu0 %v4705_v47  ;;  %v4783_v47 = vld [vmem:[#allocation6 + $0x388] ss:$48 sps:$4 sm:$0xff]  }
 0x1ab   : > { %2986 = vmatprep.subr.bf16.mxu0 %v4710_v49  ;;  %v4788_v49 = vld [vmem:[#allocation6 + $0x3ec] ss:$48 sps:$4 sm:$0xff]   ;;  %3046 = vmatpush1.bf16.msra.mxu1 %v4783_v47 }
 0x1ac   : > { %3047 = vmatprep.subr.bf16.mxu1 %v4788_v49  ;;  %v4840_v49 = vld [vmem:[#allocation6 + $0xaa8] ss:$48 sps:$4 sm:$0xff]  }
 0x1ad   : > { %2978 = vmatmul.mubr.bf16.vlgmr.msra.gmra.mrb[8].mxu0 %v5274_v5 }
 0x1ae   : > { %2987 = vmatpush1.bf16.msra.mxu0 %v4708_v50  ;;  %3018 = vmatprep.mubr.bf16.mxu0 %v5283_v30  ;;  %v4786_v50 = vld [vmem:[#allocation6 + $0x3e8] ss:$48 sps:$4 sm:$0xff]  }
 0x1af   : > { %2988 = vmatprep.subr.bf16.mxu0 %v4713_v51  ;;  %v4791_v51 = vld [vmem:[#allocation6 + $0x44c] ss:$48 sps:$4 sm:$0xff]   ;;  %3048 = vmatpush1.bf16.msra.mxu1 %v4786_v50 }
 0x1b0   : > { %3049 = vmatprep.subr.bf16.mxu1 %v4791_v51  ;;  %v4845_v50 = vld [vmem:[#allocation6 + $0xb0c] ss:$48 sps:$4 sm:$0xff]  }
 0x1b2   : > { %2989 = vmatpush1.bf16.msra.mxu0 %v4711_v52  ;;  %v4789_v52 = vld [vmem:[#allocation6 + $0x448] ss:$48 sps:$4 sm:$0xff]  }
 0x1b3   : > { %2990 = vmatprep.subr.bf16.mxu0 %v4716_v53  ;;  %v4794_v53 = vld [vmem:[#allocation6 + $0x4ac] ss:$48 sps:$4 sm:$0xff]   ;;  %3050 = vmatpush1.bf16.msra.mxu1 %v4789_v52  ;;  %v630_v52 = vrot.slane %v5323_v26, %v629_v41 }
 0x1b4   : > { %3051 = vmatprep.subr.bf16.mxu1 %v4794_v53 }
 0x1b6   : > { %2991 = vmatpush1.bf16.msra.mxu0 %v4714_v54  ;;  %v4792_v54 = vld [vmem:[#allocation6 + $0x4a8] ss:$48 sps:$4 sm:$0xff]  }
 0x1b7   : > { %2992 = vmatprep.subr.bf16.mxu0 %v4719_v55  ;;  %v4797_v55 = vld [vmem:[#allocation6 + $0x50c] ss:$48 sps:$4 sm:$0xff]   ;;  %3052 = vmatpush1.bf16.msra.mxu1 %v4792_v54  ;;  %v4843_v54 = vld [vmem:[#allocation6 + $0xb08] ss:$48 sps:$4 sm:$0xff]  }
 0x1b8   : > { %3053 = vmatprep.subr.bf16.mxu1 %v4797_v55 }
 0x1ba   : > { %2993 = vmatpush1.bf16.msra.mxu0 %v4717_v56  ;;  %v4795_v56 = vld [vmem:[#allocation6 + $0x508] ss:$48 sps:$4 sm:$0xff]  }
 0x1bb   : > { %2994 = vmatprep.subr.bf16.mxu0 %v4722_v57  ;;  %v4800_v57 = vld [vmem:[#allocation6 + $0x56c] ss:$48 sps:$4 sm:$0xff]   ;;  %3054 = vmatpush1.bf16.msra.mxu1 %v4795_v56  ;;  %v633_v56 = vsub.s32 2, %v5319_v21 }
 0x1bc   : > { %3055 = vmatprep.subr.bf16.mxu1 %v4800_v57 }
 0x1be   : > { %2995 = vmatpush1.bf16.msra.mxu0 %v4720_v58  ;;  %v4798_v58 = vld [vmem:[#allocation6 + $0x568] ss:$48 sps:$4 sm:$0xff]  }
 0x1bf   : > { %2996 = vmatprep.subr.bf16.mxu0 %v4725_v59  ;;  %v4803_v59 = vld [vmem:[#allocation6 + $0x5cc] ss:$48 sps:$4 sm:$0xff]   ;;  %3056 = vmatpush1.bf16.msra.mxu1 %v4798_v58 }
 0x1c0   : > { %v5305_v62 = vpop.f32.mrb[0].mxu0  ;;  %v5307_v63 = vpop.f32.mrb[0].mxu1  ;;  %3057 = vmatprep.subr.bf16.mxu1 %v4803_v59  ;;  %v4848_v58 = vld [vmem:[#allocation6 + $0xb6c] ss:$48 sps:$4 sm:$0xff]  }
 0x1c1   : > { %v5309_v0 = vpop.f32.mrb[1].mxu0  ;;  %v5311_v1 = vpop.f32.mrb[1].mxu1 }
 0x1c2   : > { %v2696_v2 = vpop.f32.mrb[2].mxu0  ;;  %v2778_v3 = vpop.f32.mrb[2].mxu1  ;;  %2997 = vmatpush1.bf16.msra.mxu0 %v4723_v60  ;;  %v4801_v60 = vld [vmem:[#allocation6 + $0x5c8] ss:$48 sps:$4 sm:$0xff]   ;;  %v4150_v57 = vadd.f32 %v5309_v0, %v630_v52 }
 0x1c3   : > { %v2697_v6 = vpop.f32.mrb[3].mxu0  ;;  %v2779_v7 = vpop.f32.mrb[3].mxu1  ;;  %2998 = vmatprep.subr.bf16.mxu0 %v4728_v61  ;;  %v4806_v61 = vld [vmem:[#allocation6 + $0x62c] ss:$48 sps:$4 sm:$0xff]   ;;  %3058 = vmatpush1.bf16.msra.mxu1 %v4801_v60  ;;  %v4804_v2 = vld [vmem:[#allocation6 + $0x628] ss:$48 sps:$4 sm:$0xff]  }
 0x1c4   : > { %3068 = vmatprep.subr.bf16.mxu1 %v4806_v61  ;;  %v4809_v3 = vld [vmem:[#allocation6 + $0x68c] ss:$48 sps:$4 sm:$0xff]   ;;  %v4810_v7 = vld [vmem:[#allocation6 + $0x6e8] ss:$48 sps:$4 sm:$0xff]  }
 0x1c5   : > { %v4812_v6 = vld [vmem:[#allocation6 + $0x6ec] ss:$48 sps:$4 sm:$0xff]   ;;  %v4846_v61 = vld [vmem:[#allocation6 + $0xb68] ss:$48 sps:$4 sm:$0xff]  }
 0x1c6   : > { %2999 = vmatpush1.bf16.msra.mxu0 %v4726_v4  ;;  %3060 = vmatmul.mubr.bf16.vlgmr.msra.gmra.mrb[8].mxu1 %v5274_v5  ;;  %v4807_v4 = vld [vmem:[#allocation6 + $0x688] ss:$48 sps:$4 sm:$0xff]  }
 0x1c7   : > { %3000 = vmatprep.subr.bf16.mxu0 %v4731_v8  ;;  %3069 = vmatpush1.bf16.msra.mxu1 %v4804_v2  ;;  %v4815_v8 = vld [vmem:[#allocation6 + $0x74c] ss:$48 sps:$4 sm:$0xff]   ;;  %v4819_v5 = vld [vmem:[#allocation6 + $0x808] ss:$48 sps:$4 sm:$0xff]  }
 0x1c8   : > { %3100 = vmatprep.mubr.bf16.mxu1 %v5283_v30  ;;  %3070 = vmatprep.subr.bf16.mxu1 %v4809_v3  ;;  %v4822_v30 = vld [vmem:[#allocation6 + $0x868] ss:$48 sps:$4 sm:$0xff]   ;;  %v4851_v2 = vld [vmem:[#allocation6 + $0xbcc] ss:$48 sps:$4 sm:$0xff]   ;;  %v634_v3 = vrot.slane %v5323_v26, %v633_v56 }
 0x1ca   : > { %3001 = vmatpush1.bf16.msra.mxu0 %v4729_v10  ;;  %v4813_v10 = vld [vmem:[#allocation6 + $0x748] ss:$48 sps:$4 sm:$0xff]  }
 0x1cb   : > { %3002 = vmatprep.subr.bf16.mxu0 %v4734_v11  ;;  %3071 = vmatpush1.bf16.msra.mxu1 %v4807_v4  ;;  %v4818_v11 = vld [vmem:[#allocation6 + $0x7ac] ss:$48 sps:$4 sm:$0xff]   ;;  %v3236_v4 = vmul.f32 0.088388346, %v4150_v57 }
 0x1cc   : > { %3072 = vmatprep.subr.bf16.mxu1 %v4812_v6  ;;  %v653_v6 = vsub.s32 7, %v5319_v21 }
 0x1ce   : > { %3003 = vmatpush1.bf16.msra.mxu0 %v4732_v12  ;;  %v4816_v12 = vld [vmem:[#allocation6 + $0x7a8] ss:$48 sps:$4 sm:$0xff]  }
 0x1cf   : > { %3004 = vmatprep.subr.bf16.mxu0 %v4737_v13  ;;  %3073 = vmatpush1.bf16.msra.mxu1 %v4810_v7  ;;  %v4821_v13 = vld [vmem:[#allocation6 + $0x80c] ss:$48 sps:$4 sm:$0xff]   ;;  %v4849_v7 = vld [vmem:[#allocation6 + $0xbc8] ss:$48 sps:$4 sm:$0xff]  }
 0x1d0   : > { %3074 = vmatprep.subr.bf16.mxu1 %v4815_v8  ;;  %v4151_v8 = vadd.f32 %v5307_v63, %v634_v3 }
 0x1d2   : > { %3005 = vmatpush1.bf16.msra.mxu0 %v4735_v14  ;;  %v4824_v14 = vld [vmem:[#allocation6 + $0x86c] ss:$48 sps:$4 sm:$0xff]  }
 0x1d3   : > { %3006 = vmatprep.subr.bf16.mxu0 %v4740_v15  ;;  %3075 = vmatpush1.bf16.msra.mxu1 %v4813_v10  ;;  %v4827_v15 = vld [vmem:[#allocation6 + $0x8cc] ss:$48 sps:$4 sm:$0xff]   ;;  %v3237_v10 = vpack.c.bf16 %v3236_v4, %v3236_v4 }
 0x1d4   : > { %3076 = vmatprep.subr.bf16.mxu1 %v4818_v11  ;;  %v637_v11 = vsub.s32 3, %v5319_v21 }
 0x1d6   : > { %3007 = vmatpush1.bf16.msra.mxu0 %v4738_v16  ;;  %v4825_v16 = vld [vmem:[#allocation6 + $0x8c8] ss:$48 sps:$4 sm:$0xff]  }
 0x1d7   : > { %3008 = vmatprep.subr.bf16.mxu0 %v4743_v17  ;;  %3077 = vmatpush1.bf16.msra.mxu1 %v4816_v12  ;;  %v4830_v17 = vld [vmem:[#allocation6 + $0x92c] ss:$48 sps:$4 sm:$0xff]  }
 0x1d8   : > { %3078 = vmatprep.subr.bf16.mxu1 %v4821_v13  ;;  %v654_v13 = vrot.slane %v5323_v26, %v653_v6 }
 0x1da   : > { %3009 = vmatpush1.bf16.msra.mxu0 %v4741_v20  ;;  %v4833_v20 = vld [vmem:[#allocation6 + $0x98c] ss:$48 sps:$4 sm:$0xff]  }
 0x1db   : > { %3010 = vmatprep.subr.bf16.mxu0 %v4746_v22  ;;  %3079 = vmatpush1.bf16.msra.mxu1 %v4819_v5  ;;  %v4831_v22 = vld [vmem:[#allocation6 + $0x988] ss:$48 sps:$4 sm:$0xff]   ;;  %v3342_v5 = vmul.f32 0.088388346, %v4151_v8 }
 0x1dc   : > { %3080 = vmatprep.subr.bf16.mxu1 %v4824_v14  ;;  %v638_v14 = vrot.slane %v5323_v26, %v637_v11 }
 0x1de   : > { %3011 = vmatpush1.bf16.msra.mxu0 %v4744_v24  ;;  %v4836_v24 = vld [vmem:[#allocation6 + $0x9ec] ss:$48 sps:$4 sm:$0xff]  }
 0x1df   : > { %3012 = vmatprep.subr.bf16.mxu0 %v4749_v25  ;;  %3081 = vmatpush1.bf16.msra.mxu1 %v4822_v30  ;;  %v625_v25 = vsub.s32 0, %v5319_v21  ;;  %v3343_v30 = vpack.c.bf16 %v3342_v5, %v3342_v5 }
 0x1e0   : > { %3082 = vmatprep.subr.bf16.mxu1 %v4827_v15  ;;  %v4152_v15 = vadd.f32 %v5311_v1, %v638_v14 }
 0x1e2   : > { %3013 = vmatpush1.bf16.msra.mxu0 %v4747_v28  ;;  %v642_v28 = vrot.slane %v5323_v26, %v641_v23 }
 0x1e3   : > { %3014 = vmatprep.subr.bf16.mxu0 %v4752_v48  ;;  %3083 = vmatpush1.bf16.msra.mxu1 %v4825_v16  ;;  %v626_v48 = vrot.slane %v5323_v26, %v625_v25 }
 0x1e4   : > { %3084 = vmatprep.subr.bf16.mxu1 %v4830_v17  ;;  %v3448_v17 = vmul.f32 0.088388346, %v4152_v15 }
 0x1e5   : > { %v4149_v39 = vadd.f32 %v5305_v62, %v626_v48  ;;  %v649_v62 = vsub.s32 6, %v5319_v21 }
 0x1e6   : > { %3015 = vmatpush1.bf16.msra.mxu0 %v4750_v32  ;;  %v3449_v18 = vpack.c.bf16 %v3448_v17, %v3448_v17 }
 0x1e7   : > { %3016 = vmatprep.subr.bf16.mxu0 %v4755_v33  ;;  %3085 = vmatpush1.bf16.msra.mxu1 %v4828_v19  ;;  %v3128_v51 = vmul.f32 0.088388346, %v4149_v39  ;;  %v650_v59 = vrot.slane %v5323_v26, %v649_v62  ;;  %v5364_v19 = vld [vmem:[#allocation8 + $0x8] sm:$0xf] }
 0x1e8   : > { %3086 = vmatprep.subr.bf16.mxu1 %v4833_v20 }
 0x1e9   : > { %v3129_v55 = vpack.c.bf16 %v3128_v51, %v3128_v51 }
 0x1ea   : > { %3017 = vmatpush1.bf16.msra.mxu0 %v4753_v37 }
 0x1eb   : > { %4101 = vmatprep.subr.bf16.mxu0 %v5047_v40  ;;  %3087 = vmatpush1.bf16.msra.mxu1 %v4831_v22 }
 0x1ec   : > { %3088 = vmatprep.subr.bf16.mxu1 %v4836_v24 }
 0x1ed   : > { %3019 = vmatmul.mubr.bf16.vlgmr.msra.gmra.mrb[8].mxu0 %v5289_v9 }
 0x1ee   : > { %4103 = vmatprep.mubr.msk.bf16.mxu0 %vm5048_vm0, %v5047_v40 }
 0x1ef   : > { %3089 = vmatpush1.bf16.msra.mxu1 %v4834_v27 }
 0x1f0   : > { %3090 = vmatprep.subr.bf16.mxu1 %v4839_v29 }
 0x1f3   : > { %3091 = vmatpush1.bf16.msra.mxu1 %v4837_v34 }
 0x1f4   : > { %3092 = vmatprep.subr.bf16.mxu1 %v4842_v38 }
 0x1f7   : > { %3093 = vmatpush1.bf16.msra.mxu1 %v4840_v49 }
 0x1f8   : > { %3094 = vmatprep.subr.bf16.mxu1 %v4845_v50 }
 0x1fb   : > { %3095 = vmatpush1.bf16.msra.mxu1 %v4843_v54 }
 0x1fc   : > { %3096 = vmatprep.subr.bf16.mxu1 %v4848_v58 }
 0x1ff   : > { %3097 = vmatpush1.bf16.msra.mxu1 %v4846_v61 }
 0x200   : > { %3098 = vmatprep.subr.bf16.mxu1 %v4851_v2 }
 0x203   : > { %3099 = vmatpush1.bf16.msra.mxu1 %v4849_v7 }
 0x204   : > { %4107 = vmatprep.subr.bf16.mxu1 %v5047_v40 }
 0x206   : > { %3101 = vmatmul.mubr.bf16.vlgmr.msra.gmra.mrb[8].mxu1 %v5289_v9  ;;  %v658_v9 = vrot.slane %v5364_v19, %v625_v25 }
 0x207   : > { %4109 = vmatprep.mubr.msk.bf16.mxu1 %vm5048_vm0, %v5047_v40 }
 0x240   : > { %v2856_v32 = vpop.f32.mrb[4].mxu0  ;;  %v2938_v33 = vpop.f32.mrb[4].mxu1 }
 0x241   : > { %v4153_v35 = vadd.f32 %v2856_v32, %v642_v28  ;;  %v2858_v36 = vpop.f32.mrb[5].mxu0  ;;  %v2940_v37 = vpop.f32.mrb[5].mxu1  ;;  %v4155_v0 = vadd.f32 %v2938_v33, %v650_v59 }
 0x242   : > { %v2860_v42 = vpop.f32.mrb[6].mxu0  ;;  %v2942_v43 = vpop.f32.mrb[6].mxu1  ;;  %v4154_v53 = vadd.f32 %v2858_v36, %v646_v45  ;;  %v4156_v63 = vadd.f32 %v2940_v37, %v654_v13 }
 0x243   : > { %v3131_v44 = vpack.c.bf16 %v4153_v35, %v4153_v35  ;;  %v2861_v46 = vpop.f32.mrb[7].mxu0  ;;  %v2943_v47 = vpop.f32.mrb[7].mxu1  ;;  %v3345_v12 = vpack.c.bf16 %v4155_v0, %v4155_v0 }
 0x244   : > { %v3239_v60 = vpack.c.bf16 %v4154_v53, %v4154_v53  ;;  %v3451_v16 = vpack.c.bf16 %v4156_v63, %v4156_v63 }
 0x245   : > { %4102 = vmatpush3.bf16.xpose.msra.mxu0 %v3131_v44 }
 0x246   : > { %4113 = vmatprep.subr.bf16.mxu0 %v5047_v40 }
 0x24c   : > { %4104 = vmatmul.mubr.bf16.vlgmr.msra.gmra.mrb[12].mxu0 %v3129_v55 }
 0x24d   : > { %4114 = vmatpush3.bf16.xpose.msra.mxu0 %v3239_v60  ;;  %4115 = vmatprep.mubr.msk.bf16.mxu0 %vm5048_vm0, %v5047_v40 }
 0x24e   : > { %4125 = vmatprep.subr.bf16.mxu0 %v5047_v40 }
 0x254   : > { %4116 = vmatmul.mubr.bf16.vlgmr.msra.gmra.mrb[16].mxu0 %v3237_v10 }
 0x255   : > { %4126 = vmatpush3.bf16.xpose.msra.mxu0 %v3345_v12  ;;  %4127 = vmatprep.mubr.msk.bf16.mxu0 %vm5048_vm0, %v5047_v40 }
 0x256   : > { %4137 = vmatprep.subr.bf16.mxu0 %v5047_v40 }
 0x25c   : > { %4128 = vmatmul.mubr.bf16.vlgmr.msra.gmra.mrb[20].mxu0 %v3343_v30  ;;  %v662_v30 = vrot.slane %v5364_v19, %v629_v41 }
 0x25d   : > { %4138 = vmatpush3.bf16.xpose.msra.mxu0 %v3451_v16  ;;  %4139 = vmatprep.mubr.msk.bf16.mxu0 %vm5048_vm0, %v5047_v40 }
 0x264   : > { %4140 = vmatmul.mubr.bf16.vlgmr.msra.gmra.mrb[24].mxu0 %v3449_v18 }
 0x2c0   : > { %v3020_v20 = vpop.f32.mrb[8].mxu0 }
 0x2c1   : > { %v4157_v22 = vadd.f32 %v3020_v20, %v658_v9  ;;  %v5369_v23 = vpop.f32.mrb[9].mxu0  ;;  %v666_v9 = vrot.slane %v5364_v19, %v633_v56  ;;  %v670_v56 = vrot.slane %v5364_v19, %v637_v11 }
 0x2c2   : > { %v3024_v1 = vpop.f32.mrb[10].mxu0  ;;  %v4158_v15 = vadd.f32 %v5369_v23, %v662_v30 }
 0x2c3   : > { %v3133_v24 = vpack.c.bf16 %v4157_v22, %v4157_v22  ;;  %v3025_v26 = vpop.f32.mrb[11].mxu0 }
 0x2c4   : > { %v3241_v18 = vpack.c.bf16 %v4158_v15, %v4158_v15 }
 0x2c5   : > { %v3192_v27 = vsel %vm3190_vm1, %v3133_v24, 0 }
 0x2c6   : > { %4108 = vmatpush3.bf16.msra.mxu1 %v3192_v27  ;;  %v3298_v1 = vsel %vm3190_vm1, %v3241_v18, 0 }
 0x2c7   : > { %4119 = vmatprep.subr.bf16.mxu1 %v5047_v40 }
 0x2d9   : > { %v3102_v50 = vpop.f32.mrb[8].mxu1 }
 0x2da   : > { %v3104_v51 = vpop.f32.mrb[9].mxu1  ;;  %v4159_v24 = vadd.f32 %v3102_v50, %v666_v9 }
 0x2db   : > { %v3106_v52 = vpop.f32.mrb[10].mxu1 }
 0x2dc   : > { %v3107_v62 = vpop.f32.mrb[11].mxu1  ;;  %v3347_v23 = vpack.c.bf16 %v4159_v24, %v4159_v24 }
 0x31f   : > { %v3168_v28 = vpop.f32.mrb[12].mxu0 }
 0x320   : > { %v4105_v29 = vpop.f32.mrb[13].mxu0  ;;  %v3175_v48 = vsel %vm3174_vm2, %v3168_v28, -inf }
 0x321   : > { %3176 = vmax.xlane.f32.xlu0 %v3175_v48  ;;  %v3171_v25 = vpop.f32.mrb[14].mxu0  ;;  %v3404_v29 = vsel %vm3190_vm1, %v3347_v23, 0  ;;  %v4160_v48 = vadd.f32 %v3104_v51, %v670_v56 }
 0x322   : > { %v4106_v31 = vpop.f32.mrb[15].mxu0 }
 0x323   : > { %v3453_v21 = vpack.c.bf16 %v4160_v48, %v4160_v48 }
 0x325   : > { %v3510_v19 = vsel %vm3190_vm1, %v3453_v21, 0 }
 0x327   : > { %v3276_v32 = vpop.f32.mrb[16].mxu0 }
 0x328   : > { %v4117_v33 = vpop.f32.mrb[17].mxu0  ;;  %v3282_v34 = vsel %vm3174_vm2, %v3276_v32, -inf }
 0x329   : > { %3283 = vmax.xlane.f32.xlu0 %v3282_v34  ;;  %v3279_v35 = vpop.f32.mrb[18].mxu0 }
 0x32a   : > { %v4118_v36 = vpop.f32.mrb[19].mxu0 }
 0x32f   : > { %v3382_v37 = vpop.f32.mrb[20].mxu0 }
 0x330   : > { %v4129_v38 = vpop.f32.mrb[21].mxu0  ;;  %v3388_v39 = vsel %vm3174_vm2, %v3382_v37, -inf }
 0x331   : > { %3389 = vmax.xlane.f32.xlu1 %v3388_v39  ;;  %v3385_v42 = vpop.f32.mrb[22].mxu0 }
 0x332   : > { %v4130_v43 = vpop.f32.mrb[23].mxu0 }
 0x337   : > { %v3488_v44 = vpop.f32.mrb[24].mxu0 }
 0x338   : > { %v4141_v45 = vpop.f32.mrb[25].mxu0  ;;  %v3494_v46 = vsel %vm3174_vm2, %v3488_v44, -inf }
 0x339   : > { %3495 = vmax.xlane.f32.xlu1 %v3494_v46  ;;  %v3491_v47 = vpop.f32.mrb[26].mxu0 }
 0x33a   : > { %v4142_v49 = vpop.f32.mrb[27].mxu0 }
 0x3ae   : > { %v3177_v53 = vpop.xlane.xlu0 %3176 }
 0x3af   : > { %v3178_v54 = vsub.f32 %v3168_v28, %v3177_v53 }
 0x3b1   : > { %v3179_v55 = vmul.f32 1.442695, %v3178_v54 }
 0x3b3   : > { %4852 = vpow2.f32 %v3179_v55 }
 0x3b6   : > { %v3284_v57 = vpop.xlane.xlu0 %3283 }
 0x3b7   : > { %v3285_v58 = vsub.f32 %v3276_v32, %v3284_v57 }
 0x3b9   : > { %v3286_v59 = vmul.f32 1.442695, %v3285_v58 }
 0x3bb   : > { %4854 = vpow2.f32 %v3286_v59 }
 0x3bd   : > { %v4853_v60 = vpop.eup %4852 }
 0x3be   : > { %v3390_v61 = vpop.xlane.xlu1 %3389  ;;  %v3181_v2 = vsel %vm3174_vm2, %v4853_v60, 0.0 }
 0x3bf   : > { %v3391_v3 = vsub.f32 %v3382_v37, %v3390_v61  ;;  %3182 = vadd.xlane.f32.xlu0 %v3181_v2 }
 0x3c1   : > { %v3392_v4 = vmul.f32 1.442695, %v3391_v3 }
 0x3c3   : > { %4856 = vpow2.f32 %v3392_v4 }
 0x3c5   : > { %v4855_v0 = vpop.eup %4854 }
 0x3c6   : > { %v3496_v6 = vpop.xlane.xlu1 %3495  ;;  %v3288_v7 = vsel %vm3174_vm2, %v4855_v0, 0.0 }
 0x3c7   : > { %v3497_v8 = vsub.f32 %v3488_v44, %v3496_v6  ;;  %3289 = vadd.xlane.f32.xlu1 %v3288_v7 }
 0x3c9   : > { %v3498_v10 = vmul.f32 1.442695, %v3497_v8 }
 0x3cb   : > { %4858 = vpow2.f32 %v3498_v10 }
 0x3cd   : > { %v4857_v12 = vpop.eup %4856 }
 0x3ce   : > { %v3394_v13 = vsel %vm3174_vm2, %v4857_v12, 0.0 }
 0x3cf   : > { %3395 = vadd.xlane.f32.xlu0 %v3394_v13 }
 0x3d5   : > { %v4859_v5 = vpop.eup %4858 }
 0x3d6   : > { %v3500_v14 = vsel %vm3174_vm2, %v4859_v5, 0.0 }
 0x3d7   : > { %3501 = vadd.xlane.f32.xlu1 %v3500_v14 }
 0x44c   : > { %v3183_v63 = vpop.xlane.xlu0 %3182 }
 0x44d   : > { %4860 = vrcp.f32 %v3183_v63 }
 0x454   : > { %v3290_v16 = vpop.xlane.xlu1 %3289 }
 0x455   : > { %4862 = vrcp.f32 %v3290_v16 }
 0x457   : > { %v4861_v17 = vpop.eup %4860 }
 0x458   : > { %v3185_v20 = vmul.f32 %v4861_v17, %v4853_v60 }
 0x45a   : > { %v3186_v22 = vpack.c.bf16 %v3185_v20, %v3185_v20 }
 0x45c   : > { %4110 = vmatmul.mubr.msk.bf16.vlgmr.msra.gmra.mrb[12].mxu1 %vm3174_vm2, %v3186_v22  ;;  %v3396_v26 = vpop.xlane.xlu0 %3395 }
 0x45d   : > { %4120 = vmatpush3.bf16.msra.mxu1 %v3298_v1  ;;  %4864 = vrcp.f32 %v3396_v26  ;;  %4121 = vmatprep.mubr.msk.bf16.mxu1 %vm5048_vm0, %v5047_v40 }
 0x45e   : > { %4131 = vmatprep.subr.bf16.mxu1 %v5047_v40 }
 0x45f   : > { %v4863_v41 = vpop.eup %4862 }
 0x460   : > { %v3292_v27 = vmul.f32 %v4863_v41, %v4855_v0 }
 0x462   : > { %v3293_v28 = vpack.c.bf16 %v3292_v27, %v3292_v27 }
 0x464   : > { %4122 = vmatmul.mubr.msk.bf16.vlgmr.msra.gmra.mrb[16].mxu1 %vm3174_vm2, %v3293_v28  ;;  %v3502_v25 = vpop.xlane.xlu1 %3501 }
 0x465   : > { %4132 = vmatpush3.bf16.msra.mxu1 %v3404_v29  ;;  %4866 = vrcp.f32 %v3502_v25  ;;  %4133 = vmatprep.mubr.msk.bf16.mxu1 %vm5048_vm0, %v5047_v40 }
 0x466   : > { %4143 = vmatprep.subr.bf16.mxu1 %v5047_v40 }
 0x467   : > { %v4865_v31 = vpop.eup %4864 }
 0x468   : > { %v3398_v32 = vmul.f32 %v4865_v31, %v4857_v12 }
 0x46a   : > { %v3399_v11 = vpack.c.bf16 %v3398_v32, %v3398_v32 }
 0x46c   : > { %4134 = vmatmul.mubr.msk.bf16.vlgmr.msra.gmra.mrb[20].mxu1 %vm3174_vm2, %v3399_v11 }
 0x46d   : > { %4144 = vmatpush3.bf16.msra.mxu1 %v3510_v19  ;;  %4145 = vmatprep.mubr.msk.bf16.mxu1 %vm5048_vm0, %v5047_v40 }
 0x46f   : > { %v4867_v33 = vpop.eup %4866 }
 0x470   : > { %v3504_v34 = vmul.f32 %v4867_v33, %v4859_v5 }
 0x472   : > { %v3505_v35 = vpack.c.bf16 %v3504_v34, %v3504_v34 }
 0x474   : > { %4146 = vmatmul.mubr.msk.bf16.vlgmr.msra.gmra.mrb[24].mxu1 %vm3174_vm2, %v3505_v35 }
 0x52f   : > { %v3228_v36 = vpop.f32.mrb[12].mxu1 }
 0x530   : > { %3234 = vst [vmem:[%s227_s22] sm:$0xff] %v3228_v36  ;;  %v4111_v37 = vpop.f32.mrb[13].mxu1 }
 0x531   : > { %v3231_v38 = vpop.f32.mrb[14].mxu1 }
 0x532   : > { %v4112_v39 = vpop.f32.mrb[15].mxu1 }
 0x537   : > { %v3334_v42 = vpop.f32.mrb[16].mxu1 }
 0x538   : > { %3340 = vst [vmem:[%s227_s22 + $0x8] sm:$0xff] %v3334_v42  ;;  %v4123_v43 = vpop.f32.mrb[17].mxu1 }
 0x539   : > { %v3337_v44 = vpop.f32.mrb[18].mxu1 }
 0x53a   : > { %v4124_v45 = vpop.f32.mrb[19].mxu1 }
 0x53f   : > { %v3440_v40 = vpop.f32.mrb[20].mxu1 }
 0x540   : > { %3446 = vst [vmem:[%s227_s22 + $0x10] sm:$0xff] %v3440_v40  ;;  %v4135_v46 = vpop.f32.mrb[21].mxu1 }
 0x541   : > { %v3443_v47 = vpop.f32.mrb[22].mxu1 }
 0x542   : > { %v4136_v49 = vpop.f32.mrb[23].mxu1 }
 0x547   : > { %v3546_v50 = vpop.f32.mrb[24].mxu1 }
 0x548   : > { %3552 = vst [vmem:[%s227_s22 + $0x18] sm:$0xff] %v3546_v50  ;;  %v4147_v51 = vpop.f32.mrb[25].mxu1 }
 0x549   : > { %v3549_v52 = vpop.f32.mrb[26].mxu1 }
 0x54a   : > { %4967 = shalt.err (!%p4964_p11)
}
 0x54b   : > { %s4968_s5 = scalar_lea.hbm %s5413_s26, 512  ;;  %s4972_s10 = scalar_lea.hbm %s5463_s3, 1024 }
 0x54c   : > { %p4969_p0 = scmp.ne.s32.totalorder %s5413_s26, %s4968_s5  ;;  %p4973_p6 = scmp.lt.u32.totalorder %s5413_s26, %s5463_s3 }
 0x54d   : > { %p4974_p7 = scmp.lt.u32.totalorder %s4972_s10, %s4968_s5  ;;  %p4976_p8 = scmp.lt.u32.totalorder %s4968_s5, %s5413_s26 }
 0x54e   : > { %p4970_p4 = pnand %p4969_p0, %p5478_p12 }
 0x54f   : > { %p4975_p2 = por %p4974_p7, %p4973_p6 }
 0x550   : > { %p4971_p13 = pneg %p4970_p4 }
 0x551   : > { %p4977_p1 = por %p4976_p8, %p4975_p2 }
 0x553   : > { %p4978_p10 = pnand %p4977_p1, %p4971_p13 }
 0x555   : > { %4981 = shalt.err (!%p4978_p10)
}
 0x556   : > { %4195 = dma.vmem_to_hbm [thread:$0]  (%p5478_p12), %s5408_s24, 512, %s5413_s26, %s3554_s29   ;;  %v4148_v62 = vpop.f32.mrb[27].mxu1 }
 0x557 PF: > { %s3582_s20 = sand.u32 1, %s5020_s12   ;;  %p5479_p3 = scmp.ne.s32.totalorder %s5471_s23, 0 }
 0x558   : > { %p5480_p5 = scmp.ge.s32.totalorder %s5040_s17, 2  ;;  %s3583_s22 = scalar_lea.sflag [#allocation5], %s3582_s20 }
 0x55a   : > { %p4209_p9 = pnand %p5480_p5, %p5479_p3 }
 0x55c   : > { %5015 = dma.done.wait (!%p4209_p9), %s3583_s22, 512  }
 0x55d   : > { %5017 = vsyncadd (!%p4209_p9), %s3583_s22, 4294966784  ;;  %s20_s17 = sadd.s32 1, %s5040_s17   ;;  %s5481_s12 = smov %s5024_s13 }
 0x55e   : > { %p17_p11 = scmp.ge.s32.totalorder %s20_s17, 4   ;;  %s5482_s13 = smov %s5028_s14 }
 0x55f   : > { %s5483_s14 = smov %s5212_s30  ;;  %s5484_s15 = smov %s5036_s16 }
 0x560   : > { %s5485_s16 = smov %s5487_s11  ;;  %19 = sbr.rel (!%p17_p11) target bundleno = 7 (0x7), region = 90 }
 0x567   :  { %3588 = vsyncpa [#allocation4], 1 }
 0x568   :  { %3590 = vsyncpa [#allocation4 + $0x1], 1 }
 0x569   :  { %3591 = vsyncpa [#allocation7], 1 }
 0x56a   :  { %3592 = vsyncpa [#allocation5], 1 }
 0x56b   :  { %3594 = vsyncpa [#allocation5 + $0x1], 1 }

</bundles_post_ra>
